<compile_context>
chip_gen: v5e
topology: v5e:2x2
jax: 0.10.0
libtpu: 0.0.40
codegen_flags: <defaults>
</compile_context>

<pallas_src>
import functools

import jax
import jax.numpy as jnp
from jax.experimental import pallas as pl
from jax.experimental.pallas import tpu as pltpu  # noqa: F401  (TPU backend)

FRAMES_TO_SAVE = 3          # -> conv1 in_channels = FRAMES_TO_SAVE + 1 = 4
NUMBER_ACTIONS = 6
NEG_SLOPE = 0.01            # PyTorch LeakyReLU default

# architecture constants fixed by the PyTorch module
C1_OUT, K1_H, K1_W, S1_H, S1_W = 16, 2, 10, 2, 1
C2_OUT, K2_W, S2_W = 32, 4, 2
FC1_OUT = 256


def _leaky(v):
    return jnp.where(v >= 0, v, NEG_SLOPE * v)


# ---------------------------------------------------------------------------
# Single fused Pallas kernel: conv1 -> conv2 -> pool -> fc1 -> fc2
# ---------------------------------------------------------------------------
def _fused_cnn_kernel(p1_ref, sel_ref, w1_ref, b1_ref, w2_ref, b2_ref,
                      wf1_ref, bf1_ref, wf2_ref, bf2_ref, o_ref,
                      *, ho1, n_cols1, n_pool_cols):
    """Layouts (rows of conv-stage slabs are (oh, n), i.e. row = oh*N + n):
       p1_ref : (n_cols1, Ho1*N, Cin*kh*kw)   im2col patches per conv1 output column ow
       sel_ref: (Ho1, N, Ho1*N)               one-hot row selectors (sel[oh] @ slab -> rows of oh)
       w1_ref : (Cin*kh*kw, 16), w2_ref: (4, 16, 32)  per-tap conv2 weights
       wf1_ref: (Ho1*Wp, 32, 256)             fc1 weights pre-permuted per (oh, wp) group
       wf2_ref: (256, n_actions)
    """
    # ---- conv1 + LeakyReLU: one matmul per needed output column ow ----
    w1 = w1_ref[...]
    b1 = b1_ref[...]
    y1 = []
    for ow in range(n_cols1):
        y1.append(_leaky(jnp.dot(p1_ref[ow], w1,
                                 preferred_element_type=jnp.float32) + b1))   # (Ho1*N, 16)

    # ---- conv2 + LeakyReLU (accumulated over the 4 kw taps), fused MaxPool((1,2)) ----
    b2 = b2_ref[...]

    def conv2_col(ow2):
        acc = jnp.dot(y1[S2_W * ow2], w2_ref[0], preferred_element_type=jnp.float32)
        for j in range(1, K2_W):
            acc = acc + jnp.dot(y1[S2_W * ow2 + j], w2_ref[j],
                                preferred_element_type=jnp.float32)
        return _leaky(acc + b2)                                                # (Ho1*N, 32)

    pooled = [jnp.maximum(conv2_col(2 * wp), conv2_col(2 * wp + 1))
              for wp in range(n_pool_cols)]                                    # Wp x (Ho1*N, 32)

    # ---- flatten + fc1 + LeakyReLU ----
    # PyTorch flatten index = c*(Ho1*Wp) + oh*Wp + wp.  Contract per (oh, wp) group:
    # sel[oh] gathers the N batch rows of a pooled slab, wf1_ref[g] is the matching
    # (32, 256) weight slice (permuted once at init).
    acc = None
    for oh in range(ho1):
        s_oh = sel_ref[oh]                                                     # (N, Ho1*N)
        for wp in range(n_pool_cols):
            rows = jnp.dot(s_oh, pooled[wp], preferred_element_type=jnp.float32)   # (N, 32)
            g = oh * n_pool_cols + wp
            term = jnp.dot(rows, wf1_ref[g], preferred_element_type=jnp.float32)   # (N, 256)
            acc = term if acc is None else acc + term
    h = _leaky(acc + bf1_ref[...])                                             # (N, 256)

    # ---- fc2 ----
    out = jnp.dot(h, wf2_ref[...], preferred_element_type=jnp.float32) + bf2_ref[...]
    o_ref[...] = out.astype(o_ref.dtype)


# ---------------------------------------------------------------------------
# Jitted forward: tiny im2col glue + one pallas_call
# ---------------------------------------------------------------------------
@jax.jit
def cnn_forward(x, params):
    n, c_in, h, w = x.shape
    ho1 = (h - K1_H) // S1_H + 1
    wo1 = (w - K1_W) // S1_W + 1
    wo2 = (wo1 - K2_W) // S2_W + 1
    n_pool_cols = wo2 // 2                       # MaxPool2d((1,2)), floor
    n_kept2 = 2 * n_pool_cols                    # conv2 columns that survive the pool
    n_cols1 = S2_W * (n_kept2 - 1) + K2_W        # conv1 columns that affect the output

    # im2col for conv1 (only the needed columns), laid out as
    # P1[ow, oh*N + n, c*kh*kw + ki*kw + kj] = x[n, c, oh*sh + ki, ow*sw + kj]
    taps = []
    for ki in range(K1_H):
        for kj in range(K1_W):
            taps.append(x[:, :, ki:ki + S1_H * ho1:S1_H, kj:kj + n_cols1])   # (N,Cin,Ho1,n_cols1)
    t = jnp.stack(taps, axis=2)                                              # (N,Cin,kh*kw,Ho1,cols)
    p1 = t.transpose(4, 3, 0, 1, 2).reshape(n_cols1, ho1 * n, c_in * K1_H * K1_W)
    p1 = p1.astype(jnp.float32)

    # one-hot row selectors: sel[oh] @ slab == slab rows [oh*N : (oh+1)*N]
    sel = jnp.eye(ho1 * n, dtype=jnp.float32).reshape(ho1, n, ho1 * n)

    kernel = functools.partial(_fused_cnn_kernel, ho1=ho1,
                               n_cols1=n_cols1, n_pool_cols=n_pool_cols)
    out = pl.pallas_call(
        kernel,
        out_shape=jax.ShapeDtypeStruct((n, NUMBER_ACTIONS), jnp.float32),
        grid=(1,),
        in_specs=[
            pl.BlockSpec(p1.shape, lambda i: (0, 0, 0)),
            pl.BlockSpec(sel.shape, lambda i: (0, 0, 0)),
            pl.BlockSpec(params["wmat1"].shape, lambda i: (0, 0)),
            pl.BlockSpec(params["b1"].shape, lambda i: (0, 0)),
            pl.BlockSpec(params["w2taps"].shape, lambda i: (0, 0, 0)),
            pl.BlockSpec(params["b2"].shape, lambda i: (0, 0)),
            pl.BlockSpec(params["wfc1g"].shape, lambda i: (0, 0, 0)),
            pl.BlockSpec(params["bfc1"].shape, lambda i: (0, 0)),
            pl.BlockSpec(params["wfc2m"].shape, lambda i: (0, 0)),
            pl.BlockSpec(params["bfc2"].shape, lambda i: (0, 0)),
        ],
        out_specs=pl.BlockSpec((n, NUMBER_ACTIONS), lambda i: (0, 0)),
    )(p1, sel, params["wmat1"], params["b1"], params["w2taps"], params["b2"],
      params["wfc1g"], params["bfc1"], params["wfc2m"], params["bfc2"])
    return out


# ---------------------------------------------------------------------------
# Parameters: PyTorch-layout init + one-time conversion to kernel layout
# ---------------------------------------------------------------------------
def init_torch_style_params(key, input_shape, number_actions):
    """Synthetic parameters with exactly the PyTorch module's shapes."""
    cin, h, w = input_shape
    ks = jax.random.split(key, 8)
    w1 = 0.1 * jax.random.normal(ks[0], (C1_OUT, cin, K1_H, K1_W), jnp.float32)
    b1 = 0.1 * jax.random.normal(ks[1], (C1_OUT,), jnp.float32)
    w2 = 0.1 * jax.random.normal(ks[2], (C2_OUT, C1_OUT, 1, K2_W), jnp.float32)
    b2 = 0.1 * jax.random.normal(ks[3], (C2_OUT,), jnp.float32)

    # count_neurons, analytically
    ho1 = (h - K1_H) // S1_H + 1
    wo1 = (w - K1_W) // S1_W + 1
    wo2 = (wo1 - K2_W) // S2_W + 1
    flat = C2_OUT * ho1 * (wo2 // 2)

    wfc1 = 0.05 * jax.random.normal(ks[4], (FC1_OUT, flat), jnp.float32)
    bfc1 = 0.05 * jax.random.normal(ks[5], (FC1_OUT,), jnp.float32)
    wfc2 = 0.05 * jax.random.normal(ks[6], (number_actions, FC1_OUT), jnp.float32)
    bfc2 = 0.05 * jax.random.normal(ks[7], (number_actions,), jnp.float32)
    return {"w1": w1, "b1": b1, "w2": w2, "b2": b2,
            "wfc1": wfc1, "bfc1": bfc1, "wfc2": wfc2, "bfc2": bfc2}


def prepare_params(tp, input_shape):
    """One-time reshape/permutation of PyTorch-layout weights into kernel-ready layout."""
    cin, h, w = input_shape
    ho1 = (h - K1_H) // S1_H + 1
    wo1 = (w - K1_W) // S1_W + 1
    wo2 = (wo1 - K2_W) // S2_W + 1
    n_pool_cols = wo2 // 2
    n_groups = ho1 * n_pool_cols                       # flatten col = c*n_groups + (oh*Wp + wp)

    wmat1 = tp["w1"].reshape(C1_OUT, cin * K1_H * K1_W).T                 # (Cin*kh*kw, 16)
    w2taps = jnp.transpose(tp["w2"][:, :, 0, :], (2, 1, 0))               # (kw, 16, 32) = [j, c, o]
    wfc1g = jnp.transpose(tp["wfc1"].reshape(FC1_OUT, C2_OUT, n_groups),  # (groups, 32, 256)
                          (2, 1, 0))
    return {
        "wmat1": wmat1,
        "b1": tp["b1"].reshape(1, C1_OUT),
        "w2taps": w2taps,
        "b2": tp["b2"].reshape(1, C2_OUT),
        "wfc1g": wfc1g,
        "bfc1": tp["bfc1"].reshape(1, FC1_OUT),
        "wfc2m": tp["wfc2"].T,                                            # (256, n_actions)
        "bfc2": tp["bfc2"].reshape(1, -1),
    }


if __name__ == "__main__":
    key = jax.random.PRNGKey(0)
    input_shape = (FRAMES_TO_SAVE + 1, 16, 21)   # -> flatten = 32 * 8 * 2 = 512
    batch = 2

    kx, kp = jax.random.split(key)
    x = jax.random.normal(kx, (batch,) + input_shape, jnp.float32)
    torch_params = init_torch_style_params(kp, input_shape, NUMBER_ACTIONS)
    params = prepare_params(torch_params, input_shape)   # done once, outside the hot path

    out = cnn_forward(x, params)
    out = jax.block_until_ready(out)
    assert out.shape == (batch, NUMBER_ACTIONS), out.shape
    assert bool(jnp.all(jnp.isfinite(out)))
    print("KERNEL_OK")
</pallas_src>

<mosaic_0001>
module attributes {stable_mosaic.version = 11 : i64} {
  func.func @_fused_cnn_kernel(%arg0: i32, %arg1: memref<10x16x80xf32, #tpu.memory_space<vmem>>, %arg2: memref<8x2x16xf32, #tpu.memory_space<vmem>>, %arg3: memref<80x16xf32, #tpu.memory_space<vmem>>, %arg4: memref<1x16xf32, #tpu.memory_space<vmem>>, %arg5: memref<4x16x32xf32, #tpu.memory_space<vmem>>, %arg6: memref<1x32xf32, #tpu.memory_space<vmem>>, %arg7: memref<16x32x256xf32, #tpu.memory_space<vmem>>, %arg8: memref<1x256xf32, #tpu.memory_space<vmem>>, %arg9: memref<256x6xf32, #tpu.memory_space<vmem>>, %arg10: memref<1x6xf32, #tpu.memory_space<vmem>>, %arg11: memref<2x6xf32, #tpu.memory_space<vmem>>) attributes {dimension_semantics = [#tpu.dimension_semantics<arbitrary>], iteration_bounds = array<i64: 1>, scalar_prefetch = 0 : i64, scratch_operands = 0 : i64, tpu.core_type = #tpu.core_type<tc>, window_params = [{pipeline_mode = #tpu.pipeline_mode<synchronous>, transform_indices = @transform_0, window_bounds = array<i64: 10, 16, 80>}, {pipeline_mode = #tpu.pipeline_mode<synchronous>, transform_indices = @transform_1, window_bounds = array<i64: 8, 2, 16>}, {pipeline_mode = #tpu.pipeline_mode<synchronous>, transform_indices = @transform_2, window_bounds = array<i64: 80, 16>}, {pipeline_mode = #tpu.pipeline_mode<synchronous>, transform_indices = @transform_3, window_bounds = array<i64: 1, 16>}, {pipeline_mode = #tpu.pipeline_mode<synchronous>, transform_indices = @transform_4, window_bounds = array<i64: 4, 16, 32>}, {pipeline_mode = #tpu.pipeline_mode<synchronous>, transform_indices = @transform_5, window_bounds = array<i64: 1, 32>}, {pipeline_mode = #tpu.pipeline_mode<synchronous>, transform_indices = @transform_6, window_bounds = array<i64: 16, 32, 256>}, {pipeline_mode = #tpu.pipeline_mode<synchronous>, transform_indices = @transform_7, window_bounds = array<i64: 1, 256>}, {pipeline_mode = #tpu.pipeline_mode<synchronous>, transform_indices = @transform_8, window_bounds = array<i64: 256, 6>}, {pipeline_mode = #tpu.pipeline_mode<synchronous>, transform_indices = @transform_9, window_bounds = array<i64: 1, 6>}, {pipeline_mode = #tpu.pipeline_mode<synchronous>, transform_indices = @transform_10, window_bounds = array<i64: 2, 6>}]} {
    %c0 = arith.constant 0 : index
    %c0_0 = arith.constant 0 : index
    %0 = vector.load %arg3[%c0, %c0_0] : memref<80x16xf32, #tpu.memory_space<vmem>>, vector<80x16xf32>
    %c0_1 = arith.constant 0 : index
    %c0_2 = arith.constant 0 : index
    %1 = vector.load %arg4[%c0_1, %c0_2] : memref<1x16xf32, #tpu.memory_space<vmem>>, vector<1x16xf32>
    %c0_3 = arith.constant 0 : index
    %c0_4 = arith.constant 0 : index
    %c0_5 = arith.constant 0 : index
    %2 = vector.load %arg1[%c0_3, %c0_4, %c0_5] : memref<10x16x80xf32, #tpu.memory_space<vmem>>, vector<1x16x80xf32>
    %3 = vector.shape_cast %2 : vector<1x16x80xf32> to vector<16x80xf32>
    %cst = arith.constant dense<0.000000e+00> : vector<16x16xf32>
    %4 = tpu.matmul %3, %0, %cst {dimension_numbers = #tpu.dot_dimension_numbers<[1], [0], [0], [1], [0, 0, 1, 1], [], []>} : vector<16x80xf32>, vector<80x16xf32>, vector<16x16xf32> -> vector<16x16xf32>
    %5 = vector.broadcast %1 : vector<1x16xf32> to vector<16x16xf32>
    %6 = arith.addf %4, %5 : vector<16x16xf32>
    %cst_6 = arith.constant 0.000000e+00 : f32
    %7 = vector.broadcast %cst_6 : f32 to vector<16x16xf32>
    %8 = arith.cmpf oge, %6, %7 : vector<16x16xf32>
    %cst_7 = arith.constant 0.00999999977 : f32
    %9 = vector.broadcast %cst_7 : f32 to vector<16x16xf32>
    %10 = arith.mulf %9, %6 : vector<16x16xf32>
    %11 = arith.select %8, %6, %10 : vector<16x16xi1>, vector<16x16xf32>
    %c1 = arith.constant 1 : index
    %c0_8 = arith.constant 0 : index
    %c0_9 = arith.constant 0 : index
    %12 = vector.load %arg1[%c1, %c0_8, %c0_9] : memref<10x16x80xf32, #tpu.memory_space<vmem>>, vector<1x16x80xf32>
    %13 = vector.shape_cast %12 : vector<1x16x80xf32> to vector<16x80xf32>
    %cst_10 = arith.constant dense<0.000000e+00> : vector<16x16xf32>
    %14 = tpu.matmul %13, %0, %cst_10 {dimension_numbers = #tpu.dot_dimension_numbers<[1], [0], [0], [1], [0, 0, 1, 1], [], []>} : vector<16x80xf32>, vector<80x16xf32>, vector<16x16xf32> -> vector<16x16xf32>
    %15 = vector.broadcast %1 : vector<1x16xf32> to vector<16x16xf32>
    %16 = arith.addf %14, %15 : vector<16x16xf32>
    %cst_11 = arith.constant 0.000000e+00 : f32
    %17 = vector.broadcast %cst_11 : f32 to vector<16x16xf32>
    %18 = arith.cmpf oge, %16, %17 : vector<16x16xf32>
    %cst_12 = arith.constant 0.00999999977 : f32
    %19 = vector.broadcast %cst_12 : f32 to vector<16x16xf32>
    %20 = arith.mulf %19, %16 : vector<16x16xf32>
    %21 = arith.select %18, %16, %20 : vector<16x16xi1>, vector<16x16xf32>
    %c2 = arith.constant 2 : index
    %c0_13 = arith.constant 0 : index
    %c0_14 = arith.constant 0 : index
    %22 = vector.load %arg1[%c2, %c0_13, %c0_14] : memref<10x16x80xf32, #tpu.memory_space<vmem>>, vector<1x16x80xf32>
    %23 = vector.shape_cast %22 : vector<1x16x80xf32> to vector<16x80xf32>
    %cst_15 = arith.constant dense<0.000000e+00> : vector<16x16xf32>
    %24 = tpu.matmul %23, %0, %cst_15 {dimension_numbers = #tpu.dot_dimension_numbers<[1], [0], [0], [1], [0, 0, 1, 1], [], []>} : vector<16x80xf32>, vector<80x16xf32>, vector<16x16xf32> -> vector<16x16xf32>
    %25 = vector.broadcast %1 : vector<1x16xf32> to vector<16x16xf32>
    %26 = arith.addf %24, %25 : vector<16x16xf32>
    %cst_16 = arith.constant 0.000000e+00 : f32
    %27 = vector.broadcast %cst_16 : f32 to vector<16x16xf32>
    %28 = arith.cmpf oge, %26, %27 : vector<16x16xf32>
    %cst_17 = arith.constant 0.00999999977 : f32
    %29 = vector.broadcast %cst_17 : f32 to vector<16x16xf32>
    %30 = arith.mulf %29, %26 : vector<16x16xf32>
    %31 = arith.select %28, %26, %30 : vector<16x16xi1>, vector<16x16xf32>
    %c3 = arith.constant 3 : index
    %c0_18 = arith.constant 0 : index
    %c0_19 = arith.constant 0 : index
    %32 = vector.load %arg1[%c3, %c0_18, %c0_19] : memref<10x16x80xf32, #tpu.memory_space<vmem>>, vector<1x16x80xf32>
    %33 = vector.shape_cast %32 : vector<1x16x80xf32> to vector<16x80xf32>
    %cst_20 = arith.constant dense<0.000000e+00> : vector<16x16xf32>
    %34 = tpu.matmul %33, %0, %cst_20 {dimension_numbers = #tpu.dot_dimension_numbers<[1], [0], [0], [1], [0, 0, 1, 1], [], []>} : vector<16x80xf32>, vector<80x16xf32>, vector<16x16xf32> -> vector<16x16xf32>
    %35 = vector.broadcast %1 : vector<1x16xf32> to vector<16x16xf32>
    %36 = arith.addf %34, %35 : vector<16x16xf32>
    %cst_21 = arith.constant 0.000000e+00 : f32
    %37 = vector.broadcast %cst_21 : f32 to vector<16x16xf32>
    %38 = arith.cmpf oge, %36, %37 : vector<16x16xf32>
    %cst_22 = arith.constant 0.00999999977 : f32
    %39 = vector.broadcast %cst_22 : f32 to vector<16x16xf32>
    %40 = arith.mulf %39, %36 : vector<16x16xf32>
    %41 = arith.select %38, %36, %40 : vector<16x16xi1>, vector<16x16xf32>
    %c4 = arith.constant 4 : index
    %c0_23 = arith.constant 0 : index
    %c0_24 = arith.constant 0 : index
    %42 = vector.load %arg1[%c4, %c0_23, %c0_24] : memref<10x16x80xf32, #tpu.memory_space<vmem>>, vector<1x16x80xf32>
    %43 = vector.shape_cast %42 : vector<1x16x80xf32> to vector<16x80xf32>
    %cst_25 = arith.constant dense<0.000000e+00> : vector<16x16xf32>
    %44 = tpu.matmul %43, %0, %cst_25 {dimension_numbers = #tpu.dot_dimension_numbers<[1], [0], [0], [1], [0, 0, 1, 1], [], []>} : vector<16x80xf32>, vector<80x16xf32>, vector<16x16xf32> -> vector<16x16xf32>
    %45 = vector.broadcast %1 : vector<1x16xf32> to vector<16x16xf32>
    %46 = arith.addf %44, %45 : vector<16x16xf32>
    %cst_26 = arith.constant 0.000000e+00 : f32
    %47 = vector.broadcast %cst_26 : f32 to vector<16x16xf32>
    %48 = arith.cmpf oge, %46, %47 : vector<16x16xf32>
    %cst_27 = arith.constant 0.00999999977 : f32
    %49 = vector.broadcast %cst_27 : f32 to vector<16x16xf32>
    %50 = arith.mulf %49, %46 : vector<16x16xf32>
    %51 = arith.select %48, %46, %50 : vector<16x16xi1>, vector<16x16xf32>
    %c5 = arith.constant 5 : index
    %c0_28 = arith.constant 0 : index
    %c0_29 = arith.constant 0 : index
    %52 = vector.load %arg1[%c5, %c0_28, %c0_29] : memref<10x16x80xf32, #tpu.memory_space<vmem>>, vector<1x16x80xf32>
    %53 = vector.shape_cast %52 : vector<1x16x80xf32> to vector<16x80xf32>
    %cst_30 = arith.constant dense<0.000000e+00> : vector<16x16xf32>
    %54 = tpu.matmul %53, %0, %cst_30 {dimension_numbers = #tpu.dot_dimension_numbers<[1], [0], [0], [1], [0, 0, 1, 1], [], []>} : vector<16x80xf32>, vector<80x16xf32>, vector<16x16xf32> -> vector<16x16xf32>
    %55 = vector.broadcast %1 : vector<1x16xf32> to vector<16x16xf32>
    %56 = arith.addf %54, %55 : vector<16x16xf32>
    %cst_31 = arith.constant 0.000000e+00 : f32
    %57 = vector.broadcast %cst_31 : f32 to vector<16x16xf32>
    %58 = arith.cmpf oge, %56, %57 : vector<16x16xf32>
    %cst_32 = arith.constant 0.00999999977 : f32
    %59 = vector.broadcast %cst_32 : f32 to vector<16x16xf32>
    %60 = arith.mulf %59, %56 : vector<16x16xf32>
    %61 = arith.select %58, %56, %60 : vector<16x16xi1>, vector<16x16xf32>
    %c6 = arith.constant 6 : index
    %c0_33 = arith.constant 0 : index
    %c0_34 = arith.constant 0 : index
    %62 = vector.load %arg1[%c6, %c0_33, %c0_34] : memref<10x16x80xf32, #tpu.memory_space<vmem>>, vector<1x16x80xf32>
    %63 = vector.shape_cast %62 : vector<1x16x80xf32> to vector<16x80xf32>
    %cst_35 = arith.constant dense<0.000000e+00> : vector<16x16xf32>
    %64 = tpu.matmul %63, %0, %cst_35 {dimension_numbers = #tpu.dot_dimension_numbers<[1], [0], [0], [1], [0, 0, 1, 1], [], []>} : vector<16x80xf32>, vector<80x16xf32>, vector<16x16xf32> -> vector<16x16xf32>
    %65 = vector.broadcast %1 : vector<1x16xf32> to vector<16x16xf32>
    %66 = arith.addf %64, %65 : vector<16x16xf32>
    %cst_36 = arith.constant 0.000000e+00 : f32
    %67 = vector.broadcast %cst_36 : f32 to vector<16x16xf32>
    %68 = arith.cmpf oge, %66, %67 : vector<16x16xf32>
    %cst_37 = arith.constant 0.00999999977 : f32
    %69 = vector.broadcast %cst_37 : f32 to vector<16x16xf32>
    %70 = arith.mulf %69, %66 : vector<16x16xf32>
    %71 = arith.select %68, %66, %70 : vector<16x16xi1>, vector<16x16xf32>
    %c7 = arith.constant 7 : index
    %c0_38 = arith.constant 0 : index
    %c0_39 = arith.constant 0 : index
    %72 = vector.load %arg1[%c7, %c0_38, %c0_39] : memref<10x16x80xf32, #tpu.memory_space<vmem>>, vector<1x16x80xf32>
    %73 = vector.shape_cast %72 : vector<1x16x80xf32> to vector<16x80xf32>
    %cst_40 = arith.constant dense<0.000000e+00> : vector<16x16xf32>
    %74 = tpu.matmul %73, %0, %cst_40 {dimension_numbers = #tpu.dot_dimension_numbers<[1], [0], [0], [1], [0, 0, 1, 1], [], []>} : vector<16x80xf32>, vector<80x16xf32>, vector<16x16xf32> -> vector<16x16xf32>
    %75 = vector.broadcast %1 : vector<1x16xf32> to vector<16x16xf32>
    %76 = arith.addf %74, %75 : vector<16x16xf32>
    %cst_41 = arith.constant 0.000000e+00 : f32
    %77 = vector.broadcast %cst_41 : f32 to vector<16x16xf32>
    %78 = arith.cmpf oge, %76, %77 : vector<16x16xf32>
    %cst_42 = arith.constant 0.00999999977 : f32
    %79 = vector.broadcast %cst_42 : f32 to vector<16x16xf32>
    %80 = arith.mulf %79, %76 : vector<16x16xf32>
    %81 = arith.select %78, %76, %80 : vector<16x16xi1>, vector<16x16xf32>
    %c8 = arith.constant 8 : index
    %c0_43 = arith.constant 0 : index
    %c0_44 = arith.constant 0 : index
    %82 = vector.load %arg1[%c8, %c0_43, %c0_44] : memref<10x16x80xf32, #tpu.memory_space<vmem>>, vector<1x16x80xf32>
    %83 = vector.shape_cast %82 : vector<1x16x80xf32> to vector<16x80xf32>
    %cst_45 = arith.constant dense<0.000000e+00> : vector<16x16xf32>
    %84 = tpu.matmul %83, %0, %cst_45 {dimension_numbers = #tpu.dot_dimension_numbers<[1], [0], [0], [1], [0, 0, 1, 1], [], []>} : vector<16x80xf32>, vector<80x16xf32>, vector<16x16xf32> -> vector<16x16xf32>
    %85 = vector.broadcast %1 : vector<1x16xf32> to vector<16x16xf32>
    %86 = arith.addf %84, %85 : vector<16x16xf32>
    %cst_46 = arith.constant 0.000000e+00 : f32
    %87 = vector.broadcast %cst_46 : f32 to vector<16x16xf32>
    %88 = arith.cmpf oge, %86, %87 : vector<16x16xf32>
    %cst_47 = arith.constant 0.00999999977 : f32
    %89 = vector.broadcast %cst_47 : f32 to vector<16x16xf32>
    %90 = arith.mulf %89, %86 : vector<16x16xf32>
    %91 = arith.select %88, %86, %90 : vector<16x16xi1>, vector<16x16xf32>
    %c9 = arith.constant 9 : index
    %c0_48 = arith.constant 0 : index
    %c0_49 = arith.constant 0 : index
    %92 = vector.load %arg1[%c9, %c0_48, %c0_49] : memref<10x16x80xf32, #tpu.memory_space<vmem>>, vector<1x16x80xf32>
    %93 = vector.shape_cast %92 : vector<1x16x80xf32> to vector<16x80xf32>
    %cst_50 = arith.constant dense<0.000000e+00> : vector<16x16xf32>
    %94 = tpu.matmul %93, %0, %cst_50 {dimension_numbers = #tpu.dot_dimension_numbers<[1], [0], [0], [1], [0, 0, 1, 1], [], []>} : vector<16x80xf32>, vector<80x16xf32>, vector<16x16xf32> -> vector<16x16xf32>
    %95 = vector.broadcast %1 : vector<1x16xf32> to vector<16x16xf32>
    %96 = arith.addf %94, %95 : vector<16x16xf32>
    %cst_51 = arith.constant 0.000000e+00 : f32
    %97 = vector.broadcast %cst_51 : f32 to vector<16x16xf32>
    %98 = arith.cmpf oge, %96, %97 : vector<16x16xf32>
    %cst_52 = arith.constant 0.00999999977 : f32
    %99 = vector.broadcast %cst_52 : f32 to vector<16x16xf32>
    %100 = arith.mulf %99, %96 : vector<16x16xf32>
    %101 = arith.select %98, %96, %100 : vector<16x16xi1>, vector<16x16xf32>
    %c0_53 = arith.constant 0 : index
    %c0_54 = arith.constant 0 : index
    %102 = vector.load %arg6[%c0_53, %c0_54] : memref<1x32xf32, #tpu.memory_space<vmem>>, vector<1x32xf32>
    %c0_55 = arith.constant 0 : index
    %c0_56 = arith.constant 0 : index
    %c0_57 = arith.constant 0 : index
    %103 = vector.load %arg5[%c0_55, %c0_56, %c0_57] : memref<4x16x32xf32, #tpu.memory_space<vmem>>, vector<1x16x32xf32>
    %104 = vector.shape_cast %103 : vector<1x16x32xf32> to vector<16x32xf32>
    %cst_58 = arith.constant dense<0.000000e+00> : vector<16x32xf32>
    %105 = tpu.matmul %11, %104, %cst_58 {dimension_numbers = #tpu.dot_dimension_numbers<[1], [0], [0], [1], [0, 0, 1, 1], [], []>} : vector<16x16xf32>, vector<16x32xf32>, vector<16x32xf32> -> vector<16x32xf32>
    %c1_59 = arith.constant 1 : index
    %c0_60 = arith.constant 0 : index
    %c0_61 = arith.constant 0 : index
    %106 = vector.load %arg5[%c1_59, %c0_60, %c0_61] : memref<4x16x32xf32, #tpu.memory_space<vmem>>, vector<1x16x32xf32>
    %107 = vector.shape_cast %106 : vector<1x16x32xf32> to vector<16x32xf32>
    %cst_62 = arith.constant dense<0.000000e+00> : vector<16x32xf32>
    %108 = tpu.matmul %21, %107, %cst_62 {dimension_numbers = #tpu.dot_dimension_numbers<[1], [0], [0], [1], [0, 0, 1, 1], [], []>} : vector<16x16xf32>, vector<16x32xf32>, vector<16x32xf32> -> vector<16x32xf32>
    %109 = arith.addf %105, %108 : vector<16x32xf32>
    %c2_63 = arith.constant 2 : index
    %c0_64 = arith.constant 0 : index
    %c0_65 = arith.constant 0 : index
    %110 = vector.load %arg5[%c2_63, %c0_64, %c0_65] : memref<4x16x32xf32, #tpu.memory_space<vmem>>, vector<1x16x32xf32>
    %111 = vector.shape_cast %110 : vector<1x16x32xf32> to vector<16x32xf32>
    %cst_66 = arith.constant dense<0.000000e+00> : vector<16x32xf32>
    %112 = tpu.matmul %31, %111, %cst_66 {dimension_numbers = #tpu.dot_dimension_numbers<[1], [0], [0], [1], [0, 0, 1, 1], [], []>} : vector<16x16xf32>, vector<16x32xf32>, vector<16x32xf32> -> vector<16x32xf32>
    %113 = arith.addf %109, %112 : vector<16x32xf32>
    %c3_67 = arith.constant 3 : index
    %c0_68 = arith.constant 0 : index
    %c0_69 = arith.constant 0 : index
    %114 = vector.load %arg5[%c3_67, %c0_68, %c0_69] : memref<4x16x32xf32, #tpu.memory_space<vmem>>, vector<1x16x32xf32>
    %115 = vector.shape_cast %114 : vector<1x16x32xf32> to vector<16x32xf32>
    %cst_70 = arith.constant dense<0.000000e+00> : vector<16x32xf32>
    %116 = tpu.matmul %41, %115, %cst_70 {dimension_numbers = #tpu.dot_dimension_numbers<[1], [0], [0], [1], [0, 0, 1, 1], [], []>} : vector<16x16xf32>, vector<16x32xf32>, vector<16x32xf32> -> vector<16x32xf32>
    %117 = arith.addf %113, %116 : vector<16x32xf32>
    %118 = vector.broadcast %102 : vector<1x32xf32> to vector<16x32xf32>
    %119 = arith.addf %117, %118 : vector<16x32xf32>
    %cst_71 = arith.constant 0.000000e+00 : f32
    %120 = vector.broadcast %cst_71 : f32 to vector<16x32xf32>
    %121 = arith.cmpf oge, %119, %120 : vector<16x32xf32>
    %cst_72 = arith.constant 0.00999999977 : f32
    %122 = vector.broadcast %cst_72 : f32 to vector<16x32xf32>
    %123 = arith.mulf %122, %119 : vector<16x32xf32>
    %124 = arith.select %121, %119, %123 : vector<16x32xi1>, vector<16x32xf32>
    %c0_73 = arith.constant 0 : index
    %c0_74 = arith.constant 0 : index
    %c0_75 = arith.constant 0 : index
    %125 = vector.load %arg5[%c0_73, %c0_74, %c0_75] : memref<4x16x32xf32, #tpu.memory_space<vmem>>, vector<1x16x32xf32>
    %126 = vector.shape_cast %125 : vector<1x16x32xf32> to vector<16x32xf32>
    %cst_76 = arith.constant dense<0.000000e+00> : vector<16x32xf32>
    %127 = tpu.matmul %31, %126, %cst_76 {dimension_numbers = #tpu.dot_dimension_numbers<[1], [0], [0], [1], [0, 0, 1, 1], [], []>} : vector<16x16xf32>, vector<16x32xf32>, vector<16x32xf32> -> vector<16x32xf32>
    %c1_77 = arith.constant 1 : index
    %c0_78 = arith.constant 0 : index
    %c0_79 = arith.constant 0 : index
    %128 = vector.load %arg5[%c1_77, %c0_78, %c0_79] : memref<4x16x32xf32, #tpu.memory_space<vmem>>, vector<1x16x32xf32>
    %129 = vector.shape_cast %128 : vector<1x16x32xf32> to vector<16x32xf32>
    %cst_80 = arith.constant dense<0.000000e+00> : vector<16x32xf32>
    %130 = tpu.matmul %41, %129, %cst_80 {dimension_numbers = #tpu.dot_dimension_numbers<[1], [0], [0], [1], [0, 0, 1, 1], [], []>} : vector<16x16xf32>, vector<16x32xf32>, vector<16x32xf32> -> vector<16x32xf32>
    %131 = arith.addf %127, %130 : vector<16x32xf32>
    %c2_81 = arith.constant 2 : index
    %c0_82 = arith.constant 0 : index
    %c0_83 = arith.constant 0 : index
    %132 = vector.load %arg5[%c2_81, %c0_82, %c0_83] : memref<4x16x32xf32, #tpu.memory_space<vmem>>, vector<1x16x32xf32>
    %133 = vector.shape_cast %132 : vector<1x16x32xf32> to vector<16x32xf32>
    %cst_84 = arith.constant dense<0.000000e+00> : vector<16x32xf32>
    %134 = tpu.matmul %51, %133, %cst_84 {dimension_numbers = #tpu.dot_dimension_numbers<[1], [0], [0], [1], [0, 0, 1, 1], [], []>} : vector<16x16xf32>, vector<16x32xf32>, vector<16x32xf32> -> vector<16x32xf32>
    %135 = arith.addf %131, %134 : vector<16x32xf32>
    %c3_85 = arith.constant 3 : index
    %c0_86 = arith.constant 0 : index
    %c0_87 = arith.constant 0 : index
    %136 = vector.load %arg5[%c3_85, %c0_86, %c0_87] : memref<4x16x32xf32, #tpu.memory_space<vmem>>, vector<1x16x32xf32>
    %137 = vector.shape_cast %136 : vector<1x16x32xf32> to vector<16x32xf32>
    %cst_88 = arith.constant dense<0.000000e+00> : vector<16x32xf32>
    %138 = tpu.matmul %61, %137, %cst_88 {dimension_numbers = #tpu.dot_dimension_numbers<[1], [0], [0], [1], [0, 0, 1, 1], [], []>} : vector<16x16xf32>, vector<16x32xf32>, vector<16x32xf32> -> vector<16x32xf32>
    %139 = arith.addf %135, %138 : vector<16x32xf32>
    %140 = vector.broadcast %102 : vector<1x32xf32> to vector<16x32xf32>
    %141 = arith.addf %139, %140 : vector<16x32xf32>
    %cst_89 = arith.constant 0.000000e+00 : f32
    %142 = vector.broadcast %cst_89 : f32 to vector<16x32xf32>
    %143 = arith.cmpf oge, %141, %142 : vector<16x32xf32>
    %cst_90 = arith.constant 0.00999999977 : f32
    %144 = vector.broadcast %cst_90 : f32 to vector<16x32xf32>
    %145 = arith.mulf %144, %141 : vector<16x32xf32>
    %146 = arith.select %143, %141, %145 : vector<16x32xi1>, vector<16x32xf32>
    %147 = arith.maximumf %124, %146 : vector<16x32xf32>
    %c0_91 = arith.constant 0 : index
    %c0_92 = arith.constant 0 : index
    %c0_93 = arith.constant 0 : index
    %148 = vector.load %arg5[%c0_91, %c0_92, %c0_93] : memref<4x16x32xf32, #tpu.memory_space<vmem>>, vector<1x16x32xf32>
    %149 = vector.shape_cast %148 : vector<1x16x32xf32> to vector<16x32xf32>
    %cst_94 = arith.constant dense<0.000000e+00> : vector<16x32xf32>
    %150 = tpu.matmul %51, %149, %cst_94 {dimension_numbers = #tpu.dot_dimension_numbers<[1], [0], [0], [1], [0, 0, 1, 1], [], []>} : vector<16x16xf32>, vector<16x32xf32>, vector<16x32xf32> -> vector<16x32xf32>
    %c1_95 = arith.constant 1 : index
    %c0_96 = arith.constant 0 : index
    %c0_97 = arith.constant 0 : index
    %151 = vector.load %arg5[%c1_95, %c0_96, %c0_97] : memref<4x16x32xf32, #tpu.memory_space<vmem>>, vector<1x16x32xf32>
    %152 = vector.shape_cast %151 : vector<1x16x32xf32> to vector<16x32xf32>
    %cst_98 = arith.constant dense<0.000000e+00> : vector<16x32xf32>
    %153 = tpu.matmul %61, %152, %cst_98 {dimension_numbers = #tpu.dot_dimension_numbers<[1], [0], [0], [1], [0, 0, 1, 1], [], []>} : vector<16x16xf32>, vector<16x32xf32>, vector<16x32xf32> -> vector<16x32xf32>
    %154 = arith.addf %150, %153 : vector<16x32xf32>
    %c2_99 = arith.constant 2 : index
    %c0_100 = arith.constant 0 : index
    %c0_101 = arith.constant 0 : index
    %155 = vector.load %arg5[%c2_99, %c0_100, %c0_101] : memref<4x16x32xf32, #tpu.memory_space<vmem>>, vector<1x16x32xf32>
    %156 = vector.shape_cast %155 : vector<1x16x32xf32> to vector<16x32xf32>
    %cst_102 = arith.constant dense<0.000000e+00> : vector<16x32xf32>
    %157 = tpu.matmul %71, %156, %cst_102 {dimension_numbers = #tpu.dot_dimension_numbers<[1], [0], [0], [1], [0, 0, 1, 1], [], []>} : vector<16x16xf32>, vector<16x32xf32>, vector<16x32xf32> -> vector<16x32xf32>
    %158 = arith.addf %154, %157 : vector<16x32xf32>
    %c3_103 = arith.constant 3 : index
    %c0_104 = arith.constant 0 : index
    %c0_105 = arith.constant 0 : index
    %159 = vector.load %arg5[%c3_103, %c0_104, %c0_105] : memref<4x16x32xf32, #tpu.memory_space<vmem>>, vector<1x16x32xf32>
    %160 = vector.shape_cast %159 : vector<1x16x32xf32> to vector<16x32xf32>
    %cst_106 = arith.constant dense<0.000000e+00> : vector<16x32xf32>
    %161 = tpu.matmul %81, %160, %cst_106 {dimension_numbers = #tpu.dot_dimension_numbers<[1], [0], [0], [1], [0, 0, 1, 1], [], []>} : vector<16x16xf32>, vector<16x32xf32>, vector<16x32xf32> -> vector<16x32xf32>
    %162 = arith.addf %158, %161 : vector<16x32xf32>
    %163 = vector.broadcast %102 : vector<1x32xf32> to vector<16x32xf32>
    %164 = arith.addf %162, %163 : vector<16x32xf32>
    %cst_107 = arith.constant 0.000000e+00 : f32
    %165 = vector.broadcast %cst_107 : f32 to vector<16x32xf32>
    %166 = arith.cmpf oge, %164, %165 : vector<16x32xf32>
    %cst_108 = arith.constant 0.00999999977 : f32
    %167 = vector.broadcast %cst_108 : f32 to vector<16x32xf32>
    %168 = arith.mulf %167, %164 : vector<16x32xf32>
    %169 = arith.select %166, %164, %168 : vector<16x32xi1>, vector<16x32xf32>
    %c0_109 = arith.constant 0 : index
    %c0_110 = arith.constant 0 : index
    %c0_111 = arith.constant 0 : index
    %170 = vector.load %arg5[%c0_109, %c0_110, %c0_111] : memref<4x16x32xf32, #tpu.memory_space<vmem>>, vector<1x16x32xf32>
    %171 = vector.shape_cast %170 : vector<1x16x32xf32> to vector<16x32xf32>
    %cst_112 = arith.constant dense<0.000000e+00> : vector<16x32xf32>
    %172 = tpu.matmul %71, %171, %cst_112 {dimension_numbers = #tpu.dot_dimension_numbers<[1], [0], [0], [1], [0, 0, 1, 1], [], []>} : vector<16x16xf32>, vector<16x32xf32>, vector<16x32xf32> -> vector<16x32xf32>
    %c1_113 = arith.constant 1 : index
    %c0_114 = arith.constant 0 : index
    %c0_115 = arith.constant 0 : index
    %173 = vector.load %arg5[%c1_113, %c0_114, %c0_115] : memref<4x16x32xf32, #tpu.memory_space<vmem>>, vector<1x16x32xf32>
    %174 = vector.shape_cast %173 : vector<1x16x32xf32> to vector<16x32xf32>
    %cst_116 = arith.constant dense<0.000000e+00> : vector<16x32xf32>
    %175 = tpu.matmul %81, %174, %cst_116 {dimension_numbers = #tpu.dot_dimension_numbers<[1], [0], [0], [1], [0, 0, 1, 1], [], []>} : vector<16x16xf32>, vector<16x32xf32>, vector<16x32xf32> -> vector<16x32xf32>
    %176 = arith.addf %172, %175 : vector<16x32xf32>
    %c2_117 = arith.constant 2 : index
    %c0_118 = arith.constant 0 : index
    %c0_119 = arith.constant 0 : index
    %177 = vector.load %arg5[%c2_117, %c0_118, %c0_119] : memref<4x16x32xf32, #tpu.memory_space<vmem>>, vector<1x16x32xf32>
    %178 = vector.shape_cast %177 : vector<1x16x32xf32> to vector<16x32xf32>
    %cst_120 = arith.constant dense<0.000000e+00> : vector<16x32xf32>
    %179 = tpu.matmul %91, %178, %cst_120 {dimension_numbers = #tpu.dot_dimension_numbers<[1], [0], [0], [1], [0, 0, 1, 1], [], []>} : vector<16x16xf32>, vector<16x32xf32>, vector<16x32xf32> -> vector<16x32xf32>
    %180 = arith.addf %176, %179 : vector<16x32xf32>
    %c3_121 = arith.constant 3 : index
    %c0_122 = arith.constant 0 : index
    %c0_123 = arith.constant 0 : index
    %181 = vector.load %arg5[%c3_121, %c0_122, %c0_123] : memref<4x16x32xf32, #tpu.memory_space<vmem>>, vector<1x16x32xf32>
    %182 = vector.shape_cast %181 : vector<1x16x32xf32> to vector<16x32xf32>
    %cst_124 = arith.constant dense<0.000000e+00> : vector<16x32xf32>
    %183 = tpu.matmul %101, %182, %cst_124 {dimension_numbers = #tpu.dot_dimension_numbers<[1], [0], [0], [1], [0, 0, 1, 1], [], []>} : vector<16x16xf32>, vector<16x32xf32>, vector<16x32xf32> -> vector<16x32xf32>
    %184 = arith.addf %180, %183 : vector<16x32xf32>
    %185 = vector.broadcast %102 : vector<1x32xf32> to vector<16x32xf32>
    %186 = arith.addf %184, %185 : vector<16x32xf32>
    %cst_125 = arith.constant 0.000000e+00 : f32
    %187 = vector.broadcast %cst_125 : f32 to vector<16x32xf32>
    %188 = arith.cmpf oge, %186, %187 : vector<16x32xf32>
    %cst_126 = arith.constant 0.00999999977 : f32
    %189 = vector.broadcast %cst_126 : f32 to vector<16x32xf32>
    %190 = arith.mulf %189, %186 : vector<16x32xf32>
    %191 = arith.select %188, %186, %190 : vector<16x32xi1>, vector<16x32xf32>
    %192 = arith.maximumf %169, %191 : vector<16x32xf32>
    %c0_127 = arith.constant 0 : index
    %c0_128 = arith.constant 0 : index
    %c0_129 = arith.constant 0 : index
    %193 = vector.load %arg2[%c0_127, %c0_128, %c0_129] : memref<8x2x16xf32, #tpu.memory_space<vmem>>, vector<1x2x16xf32>
    %194 = vector.shape_cast %193 : vector<1x2x16xf32> to vector<2x16xf32>
    %cst_130 = arith.constant dense<0.000000e+00> : vector<2x32xf32>
    %195 = tpu.matmul %194, %147, %cst_130 {dimension_numbers = #tpu.dot_dimension_numbers<[1], [0], [0], [1], [0, 0, 1, 1], [], []>} : vector<2x16xf32>, vector<16x32xf32>, vector<2x32xf32> -> vector<2x32xf32>
    %c0_131 = arith.constant 0 : index
    %c0_132 = arith.constant 0 : index
    %c0_133 = arith.constant 0 : index
    %196 = vector.load %arg7[%c0_131, %c0_132, %c0_133] : memref<16x32x256xf32, #tpu.memory_space<vmem>>, vector<1x32x256xf32>
    %197 = vector.shape_cast %196 : vector<1x32x256xf32> to vector<32x256xf32>
    %cst_134 = arith.constant dense<0.000000e+00> : vector<2x256xf32>
    %198 = tpu.matmul %195, %197, %cst_134 {dimension_numbers = #tpu.dot_dimension_numbers<[1], [0], [0], [1], [0, 0, 1, 1], [], []>} : vector<2x32xf32>, vector<32x256xf32>, vector<2x256xf32> -> vector<2x256xf32>
    %cst_135 = arith.constant dense<0.000000e+00> : vector<2x32xf32>
    %199 = tpu.matmul %194, %192, %cst_135 {dimension_numbers = #tpu.dot_dimension_numbers<[1], [0], [0], [1], [0, 0, 1, 1], [], []>} : vector<2x16xf32>, vector<16x32xf32>, vector<2x32xf32> -> vector<2x32xf32>
    %c1_136 = arith.constant 1 : index
    %c0_137 = arith.constant 0 : index
    %c0_138 = arith.constant 0 : index
    %200 = vector.load %arg7[%c1_136, %c0_137, %c0_138] : memref<16x32x256xf32, #tpu.memory_space<vmem>>, vector<1x32x256xf32>
    %201 = vector.shape_cast %200 : vector<1x32x256xf32> to vector<32x256xf32>
    %cst_139 = arith.constant dense<0.000000e+00> : vector<2x256xf32>
    %202 = tpu.matmul %199, %201, %cst_139 {dimension_numbers = #tpu.dot_dimension_numbers<[1], [0], [0], [1], [0, 0, 1, 1], [], []>} : vector<2x32xf32>, vector<32x256xf32>, vector<2x256xf32> -> vector<2x256xf32>
    %203 = arith.addf %198, %202 : vector<2x256xf32>
    %c1_140 = arith.constant 1 : index
    %c0_141 = arith.constant 0 : index
    %c0_142 = arith.constant 0 : index
    %204 = vector.load %arg2[%c1_140, %c0_141, %c0_142] : memref<8x2x16xf32, #tpu.memory_space<vmem>>, vector<1x2x16xf32>
    %205 = vector.shape_cast %204 : vector<1x2x16xf32> to vector<2x16xf32>
    %cst_143 = arith.constant dense<0.000000e+00> : vector<2x32xf32>
    %206 = tpu.matmul %205, %147, %cst_143 {dimension_numbers = #tpu.dot_dimension_numbers<[1], [0], [0], [1], [0, 0, 1, 1], [], []>} : vector<2x16xf32>, vector<16x32xf32>, vector<2x32xf32> -> vector<2x32xf32>
    %c2_144 = arith.constant 2 : index
    %c0_145 = arith.constant 0 : index
    %c0_146 = arith.constant 0 : index
    %207 = vector.load %arg7[%c2_144, %c0_145, %c0_146] : memref<16x32x256xf32, #tpu.memory_space<vmem>>, vector<1x32x256xf32>
    %208 = vector.shape_cast %207 : vector<1x32x256xf32> to vector<32x256xf32>
    %cst_147 = arith.constant dense<0.000000e+00> : vector<2x256xf32>
    %209 = tpu.matmul %206, %208, %cst_147 {dimension_numbers = #tpu.dot_dimension_numbers<[1], [0], [0], [1], [0, 0, 1, 1], [], []>} : vector<2x32xf32>, vector<32x256xf32>, vector<2x256xf32> -> vector<2x256xf32>
    %210 = arith.addf %203, %209 : vector<2x256xf32>
    %cst_148 = arith.constant dense<0.000000e+00> : vector<2x32xf32>
    %211 = tpu.matmul %205, %192, %cst_148 {dimension_numbers = #tpu.dot_dimension_numbers<[1], [0], [0], [1], [0, 0, 1, 1], [], []>} : vector<2x16xf32>, vector<16x32xf32>, vector<2x32xf32> -> vector<2x32xf32>
    %c3_149 = arith.constant 3 : index
    %c0_150 = arith.constant 0 : index
    %c0_151 = arith.constant 0 : index
    %212 = vector.load %arg7[%c3_149, %c0_150, %c0_151] : memref<16x32x256xf32, #tpu.memory_space<vmem>>, vector<1x32x256xf32>
    %213 = vector.shape_cast %212 : vector<1x32x256xf32> to vector<32x256xf32>
    %cst_152 = arith.constant dense<0.000000e+00> : vector<2x256xf32>
    %214 = tpu.matmul %211, %213, %cst_152 {dimension_numbers = #tpu.dot_dimension_numbers<[1], [0], [0], [1], [0, 0, 1, 1], [], []>} : vector<2x32xf32>, vector<32x256xf32>, vector<2x256xf32> -> vector<2x256xf32>
    %215 = arith.addf %210, %214 : vector<2x256xf32>
    %c2_153 = arith.constant 2 : index
    %c0_154 = arith.constant 0 : index
    %c0_155 = arith.constant 0 : index
    %216 = vector.load %arg2[%c2_153, %c0_154, %c0_155] : memref<8x2x16xf32, #tpu.memory_space<vmem>>, vector<1x2x16xf32>
    %217 = vector.shape_cast %216 : vector<1x2x16xf32> to vector<2x16xf32>
    %cst_156 = arith.constant dense<0.000000e+00> : vector<2x32xf32>
    %218 = tpu.matmul %217, %147, %cst_156 {dimension_numbers = #tpu.dot_dimension_numbers<[1], [0], [0], [1], [0, 0, 1, 1], [], []>} : vector<2x16xf32>, vector<16x32xf32>, vector<2x32xf32> -> vector<2x32xf32>
    %c4_157 = arith.constant 4 : index
    %c0_158 = arith.constant 0 : index
    %c0_159 = arith.constant 0 : index
    %219 = vector.load %arg7[%c4_157, %c0_158, %c0_159] : memref<16x32x256xf32, #tpu.memory_space<vmem>>, vector<1x32x256xf32>
    %220 = vector.shape_cast %219 : vector<1x32x256xf32> to vector<32x256xf32>
    %cst_160 = arith.constant dense<0.000000e+00> : vector<2x256xf32>
    %221 = tpu.matmul %218, %220, %cst_160 {dimension_numbers = #tpu.dot_dimension_numbers<[1], [0], [0], [1], [0, 0, 1, 1], [], []>} : vector<2x32xf32>, vector<32x256xf32>, vector<2x256xf32> -> vector<2x256xf32>
    %222 = arith.addf %215, %221 : vector<2x256xf32>
    %cst_161 = arith.constant dense<0.000000e+00> : vector<2x32xf32>
    %223 = tpu.matmul %217, %192, %cst_161 {dimension_numbers = #tpu.dot_dimension_numbers<[1], [0], [0], [1], [0, 0, 1, 1], [], []>} : vector<2x16xf32>, vector<16x32xf32>, vector<2x32xf32> -> vector<2x32xf32>
    %c5_162 = arith.constant 5 : index
    %c0_163 = arith.constant 0 : index
    %c0_164 = arith.constant 0 : index
    %224 = vector.load %arg7[%c5_162, %c0_163, %c0_164] : memref<16x32x256xf32, #tpu.memory_space<vmem>>, vector<1x32x256xf32>
    %225 = vector.shape_cast %224 : vector<1x32x256xf32> to vector<32x256xf32>
    %cst_165 = arith.constant dense<0.000000e+00> : vector<2x256xf32>
    %226 = tpu.matmul %223, %225, %cst_165 {dimension_numbers = #tpu.dot_dimension_numbers<[1], [0], [0], [1], [0, 0, 1, 1], [], []>} : vector<2x32xf32>, vector<32x256xf32>, vector<2x256xf32> -> vector<2x256xf32>
    %227 = arith.addf %222, %226 : vector<2x256xf32>
    %c3_166 = arith.constant 3 : index
    %c0_167 = arith.constant 0 : index
    %c0_168 = arith.constant 0 : index
    %228 = vector.load %arg2[%c3_166, %c0_167, %c0_168] : memref<8x2x16xf32, #tpu.memory_space<vmem>>, vector<1x2x16xf32>
    %229 = vector.shape_cast %228 : vector<1x2x16xf32> to vector<2x16xf32>
    %cst_169 = arith.constant dense<0.000000e+00> : vector<2x32xf32>
    %230 = tpu.matmul %229, %147, %cst_169 {dimension_numbers = #tpu.dot_dimension_numbers<[1], [0], [0], [1], [0, 0, 1, 1], [], []>} : vector<2x16xf32>, vector<16x32xf32>, vector<2x32xf32> -> vector<2x32xf32>
    %c6_170 = arith.constant 6 : index
    %c0_171 = arith.constant 0 : index
    %c0_172 = arith.constant 0 : index
    %231 = vector.load %arg7[%c6_170, %c0_171, %c0_172] : memref<16x32x256xf32, #tpu.memory_space<vmem>>, vector<1x32x256xf32>
    %232 = vector.shape_cast %231 : vector<1x32x256xf32> to vector<32x256xf32>
    %cst_173 = arith.constant dense<0.000000e+00> : vector<2x256xf32>
    %233 = tpu.matmul %230, %232, %cst_173 {dimension_numbers = #tpu.dot_dimension_numbers<[1], [0], [0], [1], [0, 0, 1, 1], [], []>} : vector<2x32xf32>, vector<32x256xf32>, vector<2x256xf32> -> vector<2x256xf32>
    %234 = arith.addf %227, %233 : vector<2x256xf32>
    %cst_174 = arith.constant dense<0.000000e+00> : vector<2x32xf32>
    %235 = tpu.matmul %229, %192, %cst_174 {dimension_numbers = #tpu.dot_dimension_numbers<[1], [0], [0], [1], [0, 0, 1, 1], [], []>} : vector<2x16xf32>, vector<16x32xf32>, vector<2x32xf32> -> vector<2x32xf32>
    %c7_175 = arith.constant 7 : index
    %c0_176 = arith.constant 0 : index
    %c0_177 = arith.constant 0 : index
    %236 = vector.load %arg7[%c7_175, %c0_176, %c0_177] : memref<16x32x256xf32, #tpu.memory_space<vmem>>, vector<1x32x256xf32>
    %237 = vector.shape_cast %236 : vector<1x32x256xf32> to vector<32x256xf32>
    %cst_178 = arith.constant dense<0.000000e+00> : vector<2x256xf32>
    %238 = tpu.matmul %235, %237, %cst_178 {dimension_numbers = #tpu.dot_dimension_numbers<[1], [0], [0], [1], [0, 0, 1, 1], [], []>} : vector<2x32xf32>, vector<32x256xf32>, vector<2x256xf32> -> vector<2x256xf32>
    %239 = arith.addf %234, %238 : vector<2x256xf32>
    %c4_179 = arith.constant 4 : index
    %c0_180 = arith.constant 0 : index
    %c0_181 = arith.constant 0 : index
    %240 = vector.load %arg2[%c4_179, %c0_180, %c0_181] : memref<8x2x16xf32, #tpu.memory_space<vmem>>, vector<1x2x16xf32>
    %241 = vector.shape_cast %240 : vector<1x2x16xf32> to vector<2x16xf32>
    %cst_182 = arith.constant dense<0.000000e+00> : vector<2x32xf32>
    %242 = tpu.matmul %241, %147, %cst_182 {dimension_numbers = #tpu.dot_dimension_numbers<[1], [0], [0], [1], [0, 0, 1, 1], [], []>} : vector<2x16xf32>, vector<16x32xf32>, vector<2x32xf32> -> vector<2x32xf32>
    %c8_183 = arith.constant 8 : index
    %c0_184 = arith.constant 0 : index
    %c0_185 = arith.constant 0 : index
    %243 = vector.load %arg7[%c8_183, %c0_184, %c0_185] : memref<16x32x256xf32, #tpu.memory_space<vmem>>, vector<1x32x256xf32>
    %244 = vector.shape_cast %243 : vector<1x32x256xf32> to vector<32x256xf32>
    %cst_186 = arith.constant dense<0.000000e+00> : vector<2x256xf32>
    %245 = tpu.matmul %242, %244, %cst_186 {dimension_numbers = #tpu.dot_dimension_numbers<[1], [0], [0], [1], [0, 0, 1, 1], [], []>} : vector<2x32xf32>, vector<32x256xf32>, vector<2x256xf32> -> vector<2x256xf32>
    %246 = arith.addf %239, %245 : vector<2x256xf32>
    %cst_187 = arith.constant dense<0.000000e+00> : vector<2x32xf32>
    %247 = tpu.matmul %241, %192, %cst_187 {dimension_numbers = #tpu.dot_dimension_numbers<[1], [0], [0], [1], [0, 0, 1, 1], [], []>} : vector<2x16xf32>, vector<16x32xf32>, vector<2x32xf32> -> vector<2x32xf32>
    %c9_188 = arith.constant 9 : index
    %c0_189 = arith.constant 0 : index
    %c0_190 = arith.constant 0 : index
    %248 = vector.load %arg7[%c9_188, %c0_189, %c0_190] : memref<16x32x256xf32, #tpu.memory_space<vmem>>, vector<1x32x256xf32>
    %249 = vector.shape_cast %248 : vector<1x32x256xf32> to vector<32x256xf32>
    %cst_191 = arith.constant dense<0.000000e+00> : vector<2x256xf32>
    %250 = tpu.matmul %247, %249, %cst_191 {dimension_numbers = #tpu.dot_dimension_numbers<[1], [0], [0], [1], [0, 0, 1, 1], [], []>} : vector<2x32xf32>, vector<32x256xf32>, vector<2x256xf32> -> vector<2x256xf32>
    %251 = arith.addf %246, %250 : vector<2x256xf32>
    %c5_192 = arith.constant 5 : index
    %c0_193 = arith.constant 0 : index
    %c0_194 = arith.constant 0 : index
    %252 = vector.load %arg2[%c5_192, %c0_193, %c0_194] : memref<8x2x16xf32, #tpu.memory_space<vmem>>, vector<1x2x16xf32>
    %253 = vector.shape_cast %252 : vector<1x2x16xf32> to vector<2x16xf32>
    %cst_195 = arith.constant dense<0.000000e+00> : vector<2x32xf32>
    %254 = tpu.matmul %253, %147, %cst_195 {dimension_numbers = #tpu.dot_dimension_numbers<[1], [0], [0], [1], [0, 0, 1, 1], [], []>} : vector<2x16xf32>, vector<16x32xf32>, vector<2x32xf32> -> vector<2x32xf32>
    %c10 = arith.constant 10 : index
    %c0_196 = arith.constant 0 : index
    %c0_197 = arith.constant 0 : index
    %255 = vector.load %arg7[%c10, %c0_196, %c0_197] : memref<16x32x256xf32, #tpu.memory_space<vmem>>, vector<1x32x256xf32>
    %256 = vector.shape_cast %255 : vector<1x32x256xf32> to vector<32x256xf32>
    %cst_198 = arith.constant dense<0.000000e+00> : vector<2x256xf32>
    %257 = tpu.matmul %254, %256, %cst_198 {dimension_numbers = #tpu.dot_dimension_numbers<[1], [0], [0], [1], [0, 0, 1, 1], [], []>} : vector<2x32xf32>, vector<32x256xf32>, vector<2x256xf32> -> vector<2x256xf32>
    %258 = arith.addf %251, %257 : vector<2x256xf32>
    %cst_199 = arith.constant dense<0.000000e+00> : vector<2x32xf32>
    %259 = tpu.matmul %253, %192, %cst_199 {dimension_numbers = #tpu.dot_dimension_numbers<[1], [0], [0], [1], [0, 0, 1, 1], [], []>} : vector<2x16xf32>, vector<16x32xf32>, vector<2x32xf32> -> vector<2x32xf32>
    %c11 = arith.constant 11 : index
    %c0_200 = arith.constant 0 : index
    %c0_201 = arith.constant 0 : index
    %260 = vector.load %arg7[%c11, %c0_200, %c0_201] : memref<16x32x256xf32, #tpu.memory_space<vmem>>, vector<1x32x256xf32>
    %261 = vector.shape_cast %260 : vector<1x32x256xf32> to vector<32x256xf32>
    %cst_202 = arith.constant dense<0.000000e+00> : vector<2x256xf32>
    %262 = tpu.matmul %259, %261, %cst_202 {dimension_numbers = #tpu.dot_dimension_numbers<[1], [0], [0], [1], [0, 0, 1, 1], [], []>} : vector<2x32xf32>, vector<32x256xf32>, vector<2x256xf32> -> vector<2x256xf32>
    %263 = arith.addf %258, %262 : vector<2x256xf32>
    %c6_203 = arith.constant 6 : index
    %c0_204 = arith.constant 0 : index
    %c0_205 = arith.constant 0 : index
    %264 = vector.load %arg2[%c6_203, %c0_204, %c0_205] : memref<8x2x16xf32, #tpu.memory_space<vmem>>, vector<1x2x16xf32>
    %265 = vector.shape_cast %264 : vector<1x2x16xf32> to vector<2x16xf32>
    %cst_206 = arith.constant dense<0.000000e+00> : vector<2x32xf32>
    %266 = tpu.matmul %265, %147, %cst_206 {dimension_numbers = #tpu.dot_dimension_numbers<[1], [0], [0], [1], [0, 0, 1, 1], [], []>} : vector<2x16xf32>, vector<16x32xf32>, vector<2x32xf32> -> vector<2x32xf32>
    %c12 = arith.constant 12 : index
    %c0_207 = arith.constant 0 : index
    %c0_208 = arith.constant 0 : index
    %267 = vector.load %arg7[%c12, %c0_207, %c0_208] : memref<16x32x256xf32, #tpu.memory_space<vmem>>, vector<1x32x256xf32>
    %268 = vector.shape_cast %267 : vector<1x32x256xf32> to vector<32x256xf32>
    %cst_209 = arith.constant dense<0.000000e+00> : vector<2x256xf32>
    %269 = tpu.matmul %266, %268, %cst_209 {dimension_numbers = #tpu.dot_dimension_numbers<[1], [0], [0], [1], [0, 0, 1, 1], [], []>} : vector<2x32xf32>, vector<32x256xf32>, vector<2x256xf32> -> vector<2x256xf32>
    %270 = arith.addf %263, %269 : vector<2x256xf32>
    %cst_210 = arith.constant dense<0.000000e+00> : vector<2x32xf32>
    %271 = tpu.matmul %265, %192, %cst_210 {dimension_numbers = #tpu.dot_dimension_numbers<[1], [0], [0], [1], [0, 0, 1, 1], [], []>} : vector<2x16xf32>, vector<16x32xf32>, vector<2x32xf32> -> vector<2x32xf32>
    %c13 = arith.constant 13 : index
    %c0_211 = arith.constant 0 : index
    %c0_212 = arith.constant 0 : index
    %272 = vector.load %arg7[%c13, %c0_211, %c0_212] : memref<16x32x256xf32, #tpu.memory_space<vmem>>, vector<1x32x256xf32>
    %273 = vector.shape_cast %272 : vector<1x32x256xf32> to vector<32x256xf32>
    %cst_213 = arith.constant dense<0.000000e+00> : vector<2x256xf32>
    %274 = tpu.matmul %271, %273, %cst_213 {dimension_numbers = #tpu.dot_dimension_numbers<[1], [0], [0], [1], [0, 0, 1, 1], [], []>} : vector<2x32xf32>, vector<32x256xf32>, vector<2x256xf32> -> vector<2x256xf32>
    %275 = arith.addf %270, %274 : vector<2x256xf32>
    %c7_214 = arith.constant 7 : index
    %c0_215 = arith.constant 0 : index
    %c0_216 = arith.constant 0 : index
    %276 = vector.load %arg2[%c7_214, %c0_215, %c0_216] : memref<8x2x16xf32, #tpu.memory_space<vmem>>, vector<1x2x16xf32>
    %277 = vector.shape_cast %276 : vector<1x2x16xf32> to vector<2x16xf32>
    %cst_217 = arith.constant dense<0.000000e+00> : vector<2x32xf32>
    %278 = tpu.matmul %277, %147, %cst_217 {dimension_numbers = #tpu.dot_dimension_numbers<[1], [0], [0], [1], [0, 0, 1, 1], [], []>} : vector<2x16xf32>, vector<16x32xf32>, vector<2x32xf32> -> vector<2x32xf32>
    %c14 = arith.constant 14 : index
    %c0_218 = arith.constant 0 : index
    %c0_219 = arith.constant 0 : index
    %279 = vector.load %arg7[%c14, %c0_218, %c0_219] : memref<16x32x256xf32, #tpu.memory_space<vmem>>, vector<1x32x256xf32>
    %280 = vector.shape_cast %279 : vector<1x32x256xf32> to vector<32x256xf32>
    %cst_220 = arith.constant dense<0.000000e+00> : vector<2x256xf32>
    %281 = tpu.matmul %278, %280, %cst_220 {dimension_numbers = #tpu.dot_dimension_numbers<[1], [0], [0], [1], [0, 0, 1, 1], [], []>} : vector<2x32xf32>, vector<32x256xf32>, vector<2x256xf32> -> vector<2x256xf32>
    %282 = arith.addf %275, %281 : vector<2x256xf32>
    %cst_221 = arith.constant dense<0.000000e+00> : vector<2x32xf32>
    %283 = tpu.matmul %277, %192, %cst_221 {dimension_numbers = #tpu.dot_dimension_numbers<[1], [0], [0], [1], [0, 0, 1, 1], [], []>} : vector<2x16xf32>, vector<16x32xf32>, vector<2x32xf32> -> vector<2x32xf32>
    %c15 = arith.constant 15 : index
    %c0_222 = arith.constant 0 : index
    %c0_223 = arith.constant 0 : index
    %284 = vector.load %arg7[%c15, %c0_222, %c0_223] : memref<16x32x256xf32, #tpu.memory_space<vmem>>, vector<1x32x256xf32>
    %285 = vector.shape_cast %284 : vector<1x32x256xf32> to vector<32x256xf32>
    %cst_224 = arith.constant dense<0.000000e+00> : vector<2x256xf32>
    %286 = tpu.matmul %283, %285, %cst_224 {dimension_numbers = #tpu.dot_dimension_numbers<[1], [0], [0], [1], [0, 0, 1, 1], [], []>} : vector<2x32xf32>, vector<32x256xf32>, vector<2x256xf32> -> vector<2x256xf32>
    %287 = arith.addf %282, %286 : vector<2x256xf32>
    %c0_225 = arith.constant 0 : index
    %c0_226 = arith.constant 0 : index
    %288 = vector.load %arg8[%c0_225, %c0_226] : memref<1x256xf32, #tpu.memory_space<vmem>>, vector<1x256xf32>
    %289 = vector.broadcast %288 : vector<1x256xf32> to vector<2x256xf32>
    %290 = arith.addf %287, %289 : vector<2x256xf32>
    %cst_227 = arith.constant 0.000000e+00 : f32
    %291 = vector.broadcast %cst_227 : f32 to vector<2x256xf32>
    %292 = arith.cmpf oge, %290, %291 : vector<2x256xf32>
    %cst_228 = arith.constant 0.00999999977 : f32
    %293 = vector.broadcast %cst_228 : f32 to vector<2x256xf32>
    %294 = arith.mulf %293, %290 : vector<2x256xf32>
    %295 = arith.select %292, %290, %294 : vector<2x256xi1>, vector<2x256xf32>
    %c0_229 = arith.constant 0 : index
    %c0_230 = arith.constant 0 : index
    %296 = vector.load %arg9[%c0_229, %c0_230] : memref<256x6xf32, #tpu.memory_space<vmem>>, vector<256x6xf32>
    %cst_231 = arith.constant dense<0.000000e+00> : vector<2x6xf32>
    %297 = tpu.matmul %295, %296, %cst_231 {dimension_numbers = #tpu.dot_dimension_numbers<[1], [0], [0], [1], [0, 0, 1, 1], [], []>} : vector<2x256xf32>, vector<256x6xf32>, vector<2x6xf32> -> vector<2x6xf32>
    %c0_232 = arith.constant 0 : index
    %c0_233 = arith.constant 0 : index
    %298 = vector.load %arg10[%c0_232, %c0_233] : memref<1x6xf32, #tpu.memory_space<vmem>>, vector<1x6xf32>
    %299 = vector.broadcast %298 : vector<1x6xf32> to vector<2x6xf32>
    %300 = arith.addf %297, %299 : vector<2x6xf32>
    %c0_234 = arith.constant 0 : index
    %c0_235 = arith.constant 0 : index
    %301 = vector.load %arg11[%c0_234, %c0_235] : memref<2x6xf32, #tpu.memory_space<vmem>>, vector<2x6xf32>
    tpu.vector_store %arg11[%c0_234, %c0_235], %300 {strides = array<i32>} : memref<2x6xf32, #tpu.memory_space<vmem>>, vector<2x6xf32>,
    return
  }
  func.func @transform_0(%arg0: i32) -> (i32, i32, i32) {
    %c0_i32 = arith.constant 0 : i32
    %c0_i32_0 = arith.constant 0 : i32
    %c0_i32_1 = arith.constant 0 : i32
    %c0_i32_2 = arith.constant 0 : i32
    return %c0_i32, %c0_i32_0, %c0_i32_1 : i32, i32, i32
  }
  func.func @transform_1(%arg0: i32) -> (i32, i32, i32) {
    %c0_i32 = arith.constant 0 : i32
    %c0_i32_0 = arith.constant 0 : i32
    %c0_i32_1 = arith.constant 0 : i32
    %c0_i32_2 = arith.constant 0 : i32
    return %c0_i32, %c0_i32_0, %c0_i32_1 : i32, i32, i32
  }
  func.func @transform_2(%arg0: i32) -> (i32, i32) {
    %c0_i32 = arith.constant 0 : i32
    %c0_i32_0 = arith.constant 0 : i32
    %c0_i32_1 = arith.constant 0 : i32
    return %c0_i32, %c0_i32_0 : i32, i32
  }
  func.func @transform_3(%arg0: i32) -> (i32, i32) {
    %c0_i32 = arith.constant 0 : i32
    %c0_i32_0 = arith.constant 0 : i32
    %c0_i32_1 = arith.constant 0 : i32
    return %c0_i32, %c0_i32_0 : i32, i32
  }
  func.func @transform_4(%arg0: i32) -> (i32, i32, i32) {
    %c0_i32 = arith.constant 0 : i32
    %c0_i32_0 = arith.constant 0 : i32
    %c0_i32_1 = arith.constant 0 : i32
    %c0_i32_2 = arith.constant 0 : i32
    return %c0_i32, %c0_i32_0, %c0_i32_1 : i32, i32, i32
  }
  func.func @transform_5(%arg0: i32) -> (i32, i32) {
    %c0_i32 = arith.constant 0 : i32
    %c0_i32_0 = arith.constant 0 : i32
    %c0_i32_1 = arith.constant 0 : i32
    return %c0_i32, %c0_i32_0 : i32, i32
  }
  func.func @transform_6(%arg0: i32) -> (i32, i32, i32) {
    %c0_i32 = arith.constant 0 : i32
    %c0_i32_0 = arith.constant 0 : i32
    %c0_i32_1 = arith.constant 0 : i32
    %c0_i32_2 = arith.constant 0 : i32
    return %c0_i32, %c0_i32_0, %c0_i32_1 : i32, i32, i32
  }
  func.func @transform_7(%arg0: i32) -> (i32, i32) {
    %c0_i32 = arith.constant 0 : i32
    %c0_i32_0 = arith.constant 0 : i32
    %c0_i32_1 = arith.constant 0 : i32
    return %c0_i32, %c0_i32_0 : i32, i32
  }
  func.func @transform_8(%arg0: i32) -> (i32, i32) {
    %c0_i32 = arith.constant 0 : i32
    %c0_i32_0 = arith.constant 0 : i32
    %c0_i32_1 = arith.constant 0 : i32
    return %c0_i32, %c0_i32_0 : i32, i32
  }
  func.func @transform_9(%arg0: i32) -> (i32, i32) {
    %c0_i32 = arith.constant 0 : i32
    %c0_i32_0 = arith.constant 0 : i32
    %c0_i32_1 = arith.constant 0 : i32
    return %c0_i32, %c0_i32_0 : i32, i32
  }
  func.func @transform_10(%arg0: i32) -> (i32, i32) {
    %c0_i32 = arith.constant 0 : i32
    %c0_i32_0 = arith.constant 0 : i32
    %c0_i32_1 = arith.constant 0 : i32
    return %c0_i32, %c0_i32_0 : i32, i32
  }
}

</mosaic_0001>

<bundles_post_ra>
// kernel: cnn_forward.1
= control target key start
LH: loop header
LB: loop body
LE: loop exit
PB: predicated region body
PF: predicated region fallthrough
CT: control target
= control target key end

     0   :  { %s3579_s0 = inlined_call_operand.vmem [shape: f32[10,16,80], index: 0, kind: input, shape index: {}]   ;;  %s3580_s1 = inlined_call_operand.vmem [shape: f32[8,2,16], index: 1, kind: input, shape index: {}]   ;;  %s3581_s2 = inlined_call_operand.vmem [shape: f32[80,16], index: 2, kind: input, shape index: {}]   ;;  %s3582_s3 = inlined_call_operand.vmem [shape: f32[1,16], index: 3, kind: input, shape index: {}]   ;;  %s3583_s4 = inlined_call_operand.vmem [shape: f32[4,16,32], index: 4, kind: input, shape index: {}]   ;;  %s3584_s5 = inlined_call_operand.vmem [shape: f32[1,32], index: 5, kind: input, shape index: {}]   ;;  %s3585_s6 = inlined_call_operand.vmem [shape: f32[16,32,256], index: 6, kind: input, shape index: {}]   ;;  %s3586_s7 = inlined_call_operand.vmem [shape: f32[1,256], index: 7, kind: input, shape index: {}]   ;;  %s3587_s8 = inlined_call_operand.vmem [shape: f32[256,6], index: 8, kind: input, shape index: {}]   ;;  %s3588_s9 = inlined_call_operand.vmem [shape: f32[1,6], index: 9, kind: input, shape index: {}]   ;;  %s3589_s10 = inlined_call_operand.hbm [shape: f32[2,6], index: 10, kind: output, shape index: {}]  }
   0x1   :  { %v2593_v0 = vld [vmem:[%s3581_s2 + $0x48] sm:$0xff]  ;;  %v2598_v1 = vld [vmem:[%s3581_s2 + $0x40] sm:$0xff]  ;;  %v2607_v2 = vld [vmem:[%s3581_s2 + $0x38] sm:$0xff] }
   0x2   :  { %65 = vmatpush.msra.mxu0 %v2593_v0  ;;  %103 = vmatpush.msra.mxu1 %v2593_v0  ;;  %v2616_v3 = vld [vmem:[%s3581_s2 + $0x30] sm:$0xff]  ;;  %v2623_v4 = vld [vmem:[%s3581_s2 + $0x28] sm:$0xff] }
   0x3   :  { %141 = vmatpush.msra.mxu2 %v2593_v0  ;;  %179 = vmatpush.msra.mxu3 %v2593_v0 }
   0x4   :  { %66 = vmatpush.msra.mxu0 %v2598_v1  ;;  %104 = vmatpush.msra.mxu1 %v2598_v1 }
   0x5   :  { %142 = vmatpush.msra.mxu2 %v2598_v1  ;;  %180 = vmatpush.msra.mxu3 %v2598_v1 }
   0x6   :  { %67 = vmatpush.msra.mxu0 %v2607_v2  ;;  %105 = vmatpush.msra.mxu1 %v2607_v2 }
   0x7   :  { %143 = vmatpush.msra.mxu2 %v2607_v2  ;;  %181 = vmatpush.msra.mxu3 %v2607_v2 }
   0x8   :  { %68 = vmatpush.msra.mxu0 %v2616_v3  ;;  %106 = vmatpush.msra.mxu1 %v2616_v3 }
   0x9   :  { %15 = vsyncpa [#allocation3], 0  ;;  %144 = vmatpush.msra.mxu2 %v2616_v3  ;;  %182 = vmatpush.msra.mxu3 %v2616_v3  ;;  %v2634_v5 = vld [vmem:[%s3581_s2 + $0x20] sm:$0xff]  ;;  %v2643_v6 = vld [vmem:[%s3581_s2 + $0x18] sm:$0xff]  ;;  %vm52_vm0 = vcmask 654336   ;;  %vm436_vm1 = vcmask 130048  }
   0xa   :  { %69 = vmatpush.msra.mxu0 %v2623_v4  ;;  %107 = vmatpush.msra.mxu1 %v2623_v4  ;;  %v2652_v7 = vld [vmem:[%s3581_s2 + $0x10] sm:$0xff]  ;;  %v2661_v8 = vld [vmem:[%s3581_s2 + $0x8] sm:$0xff]  ;;  %v2670_v9 = vld [vmem:[%s3581_s2] sm:$0xff]  ;;  %s2534_s12 = smov [#allocation2]   ;;  %s2244_s16 = sshll.u32 %s3589_s10, 4  ;;  %s2245_s16 = int_to_ptr.hbm [resolvable:$true] %s2244_s16 }
   0xb   :  { %145 = vmatpush.msra.mxu2 %v2623_v4  ;;  %183 = vmatpush.msra.mxu3 %v2623_v4  ;;  %v47_v10 = vld [vmem:[%s3579_s0] sm:$0xff]  ;;  %v2255_v11 = vld [vmem:[%s3579_s0 + $0x10] sm:$0xff]  ;;  %v2256_v14 = vld [vmem:[%s3579_s0 + $0x18] sm:$0xff]  ;;  %s2242_s13 = sshll.u32 %s2534_s12, 4  ;;  %s2243_s13 = int_to_ptr.vmem [resolvable:$true] %s2242_s13 }
   0xc   :  { %70 = vmatpush.msra.mxu0 %v2634_v5  ;;  %108 = vmatpush.msra.mxu1 %v2634_v5  ;;  %v2259_v12 = vld [vmem:[%s3579_s0 + $0x20] sm:$0xff]  ;;  %v2263_v13 = vld [vmem:[%s3579_s0 + $0x30] sm:$0xff]  ;;  %v48_v15 = vld [vmem:[%s3579_s0 + $0x8] sm:$0xff] }
   0xd   :  { %146 = vmatpush.msra.mxu2 %v2634_v5  ;;  %184 = vmatpush.msra.mxu3 %v2634_v5  ;;  %v2260_v16 = vld [vmem:[%s3579_s0 + $0x28] sm:$0xff]  ;;  %v2264_v17 = vld [vmem:[%s3579_s0 + $0x38] sm:$0xff]  ;;  %v2267_v18 = vld [vmem:[%s3579_s0 + $0x40] sm:$0xff] }
   0xe   :  { %71 = vmatpush.msra.mxu0 %v2643_v6  ;;  %109 = vmatpush.msra.mxu1 %v2643_v6  ;;  %v2271_v19 = vld [vmem:[%s3579_s0 + $0x50] sm:$0xff]  ;;  %v2275_v20 = vld [vmem:[%s3579_s0 + $0x60] sm:$0xff]  ;;  %v2268_v22 = vld [vmem:[%s3579_s0 + $0x48] sm:$0xff] }
   0xf   :  { %147 = vmatpush.msra.mxu2 %v2643_v6  ;;  %185 = vmatpush.msra.mxu3 %v2643_v6  ;;  %v2279_v21 = vld [vmem:[%s3579_s0 + $0x70] sm:$0xff]  ;;  %v2272_v23 = vld [vmem:[%s3579_s0 + $0x58] sm:$0xff]  ;;  %v2276_v24 = vld [vmem:[%s3579_s0 + $0x68] sm:$0xff] }
  0x10   :  { %72 = vmatpush.msra.mxu0 %v2652_v7  ;;  %110 = vmatpush.msra.mxu1 %v2652_v7  ;;  %v2280_v25 = vld [vmem:[%s3579_s0 + $0x78] sm:$0xff]  ;;  %v2283_v26 = vld [vmem:[%s3579_s0 + $0x80] sm:$0xff]  ;;  %v2287_v27 = vld [vmem:[%s3579_s0 + $0x90] sm:$0xff] }
  0x11   :  { %148 = vmatpush.msra.mxu2 %v2652_v7  ;;  %186 = vmatpush.msra.mxu3 %v2652_v7  ;;  %v2284_v28 = vld [vmem:[%s3579_s0 + $0x88] sm:$0xff]  ;;  %v2288_v29 = vld [vmem:[%s3579_s0 + $0x98] sm:$0xff]  ;;  %v2833_v32 = vld [vmem:[%s3583_s4 + $0x10] sm:$0xff] }
  0x12   :  { %73 = vmatpush.msra.mxu0 %v2661_v8  ;;  %111 = vmatpush.msra.mxu1 %v2661_v8  ;;  %v2823_v30 = vld [vmem:[%s3583_s4 + $0x18] sm:$0xff]  ;;  %v2828_v31 = vld [vmem:[%s3583_s4 + $0x8] sm:$0xff]  ;;  %v2840_v33 = vld [vmem:[%s3583_s4] sm:$0xff] }
  0x13   :  { %149 = vmatpush.msra.mxu2 %v2661_v8  ;;  %187 = vmatpush.msra.mxu3 %v2661_v8  ;;  %v2851_v34 = vld [vmem:[%s3583_s4 + $0x28] sm:$0xff]  ;;  %v2856_v35 = vld [vmem:[%s3583_s4 + $0x38] sm:$0xff]  ;;  %v2863_v36 = vld [vmem:[%s3583_s4 + $0x20] sm:$0xff] }
  0x14   :  { %74 = vmatpush.msra.mxu0 %v2670_v9  ;;  %112 = vmatpush.msra.mxu1 %v2670_v9  ;;  %v2868_v37 = vld [vmem:[%s3583_s4 + $0x30] sm:$0xff]  ;;  %v2879_v38 = vld [vmem:[%s3582_s3] ss:$0 sm:$0xff] }
  0x15   :  { %150 = vmatpush.msra.mxu2 %v2670_v9  ;;  %188 = vmatpush.msra.mxu3 %v2670_v9 }
  0x16   :  { %2253 = vmatmul.msk.f32.vlgmr.msra.gmra.mxu0 %vm52_vm0, %v47_v10  ;;  %2257 = vmatmul.msk.f32.vlgmr.msra.gmra.mxu1 %vm52_vm0, %v2255_v11 }
  0x17   :  { %2261 = vmatmul.msk.f32.vlgmr.msra.gmra.mxu2 %vm52_vm0, %v2259_v12  ;;  %2265 = vmatmul.msk.f32.vlgmr.msra.gmra.mxu3 %vm52_vm0, %v2263_v13 }
  0x18   :  { %217 = vmatpush.msrb.mxu0 %v2593_v0  ;;  %255 = vmatpush.msrb.mxu1 %v2593_v0 }
  0x19   :  { %293 = vmatpush.msrb.mxu2 %v2593_v0  ;;  %331 = vmatpush.msrb.mxu3 %v2593_v0 }
  0x1a   :  { %218 = vmatpush.msrb.mxu0 %v2598_v1  ;;  %256 = vmatpush.msrb.mxu1 %v2598_v1 }
  0x1b   :  { %294 = vmatpush.msrb.mxu2 %v2598_v1  ;;  %332 = vmatpush.msrb.mxu3 %v2598_v1 }
  0x1c   :  { %219 = vmatpush.msrb.mxu0 %v2607_v2  ;;  %257 = vmatpush.msrb.mxu1 %v2607_v2 }
  0x1d   :  { %295 = vmatpush.msrb.mxu2 %v2607_v2  ;;  %333 = vmatpush.msrb.mxu3 %v2607_v2 }
  0x1e   :  { %220 = vmatpush.msrb.mxu0 %v2616_v3  ;;  %2258 = vmatmul.msk.f32.gmra.mxu1 %vm52_vm0, %v2256_v14 }
  0x1f   :  { %2254 = vmatmul.msk.f32.gmra.mxu0 %vm52_vm0, %v48_v15  ;;  %2262 = vmatmul.msk.f32.gmra.mxu2 %vm52_vm0, %v2260_v16 }
  0x20   :  { %2266 = vmatmul.msk.f32.gmra.mxu3 %vm52_vm0, %v2264_v17  ;;  %221 = vmatpush.msrb.mxu0 %v2623_v4 }
  0x21   :  { %258 = vmatpush.msrb.mxu1 %v2616_v3  ;;  %296 = vmatpush.msrb.mxu2 %v2616_v3 }
  0x22   :  { %222 = vmatpush.msrb.mxu0 %v2634_v5  ;;  %334 = vmatpush.msrb.mxu3 %v2616_v3 }
  0x23   :  { %259 = vmatpush.msrb.mxu1 %v2623_v4  ;;  %297 = vmatpush.msrb.mxu2 %v2623_v4 }
  0x24   :  { %223 = vmatpush.msrb.mxu0 %v2643_v6  ;;  %335 = vmatpush.msrb.mxu3 %v2623_v4 }
  0x25   :  { %260 = vmatpush.msrb.mxu1 %v2634_v5  ;;  %298 = vmatpush.msrb.mxu2 %v2634_v5 }
  0x26   :  { %224 = vmatpush.msrb.mxu0 %v2652_v7  ;;  %336 = vmatpush.msrb.mxu3 %v2634_v5 }
  0x27   :  { %261 = vmatpush.msrb.mxu1 %v2643_v6  ;;  %299 = vmatpush.msrb.mxu2 %v2643_v6 }
  0x28   :  { %225 = vmatpush.msrb.mxu0 %v2661_v8  ;;  %337 = vmatpush.msrb.mxu3 %v2643_v6 }
  0x29   :  { %262 = vmatpush.msrb.mxu1 %v2652_v7  ;;  %300 = vmatpush.msrb.mxu2 %v2652_v7 }
  0x2a   :  { %226 = vmatpush.msrb.mxu0 %v2670_v9  ;;  %338 = vmatpush.msrb.mxu3 %v2652_v7 }
  0x2b   :  { %263 = vmatpush.msrb.mxu1 %v2661_v8  ;;  %2269 = vmatmul.msk.f32.vlgmr.msrb.gmra.mxu0 %vm52_vm0, %v2267_v18 }
  0x2c   :  { %301 = vmatpush.msrb.mxu2 %v2661_v8  ;;  %339 = vmatpush.msrb.mxu3 %v2661_v8 }
  0x2d   :  { %264 = vmatpush.msrb.mxu1 %v2670_v9  ;;  %369 = vmatpush.msra.mxu0 %v2593_v0 }
  0x2e   :  { %2273 = vmatmul.msk.f32.vlgmr.msrb.gmra.mxu1 %vm52_vm0, %v2271_v19  ;;  %302 = vmatpush.msrb.mxu2 %v2670_v9 }
  0x2f   :  { %2277 = vmatmul.msk.f32.vlgmr.msrb.gmra.mxu2 %vm52_vm0, %v2275_v20  ;;  %340 = vmatpush.msrb.mxu3 %v2670_v9 }
  0x30   :  { %2281 = vmatmul.msk.f32.vlgmr.msrb.gmra.mxu3 %vm52_vm0, %v2279_v21  ;;  %370 = vmatpush.msra.mxu0 %v2598_v1 }
  0x31   :  { %407 = vmatpush.msra.mxu1 %v2593_v0  ;;  %518 = vmatpush.msra.mxu2 %v2851_v34 }
  0x32   :  { %371 = vmatpush.msra.mxu0 %v2607_v2  ;;  %552 = vmatpush.msra.mxu3 %v2856_v35 }
  0x33   :  { %2270 = vmatmul.msk.f32.gmra.mxu0 %vm52_vm0, %v2268_v22  ;;  %408 = vmatpush.msra.mxu1 %v2598_v1 }
  0x34   :  { %372 = vmatpush.msra.mxu0 %v2616_v3  ;;  %519 = vmatpush.msra.mxu2 %v2863_v36 }
  0x35   :  { %409 = vmatpush.msra.mxu1 %v2607_v2  ;;  %553 = vmatpush.msra.mxu3 %v2868_v37 }
  0x36   :  { %2274 = vmatmul.msk.f32.gmra.mxu1 %vm52_vm0, %v2272_v23  ;;  %373 = vmatpush.msra.mxu0 %v2623_v4 }
  0x37   :  { %2278 = vmatmul.msk.f32.gmra.mxu2 %vm52_vm0, %v2276_v24  ;;  %410 = vmatpush.msra.mxu1 %v2616_v3 }
  0x38   :  { %2282 = vmatmul.msk.f32.gmra.mxu3 %vm52_vm0, %v2280_v25  ;;  %374 = vmatpush.msra.mxu0 %v2634_v5 }
  0x39   :  { %411 = vmatpush.msra.mxu1 %v2623_v4  ;;  %640 = vmatpush.msrb.mxu2 %v2851_v34 }
  0x3a   :  { %375 = vmatpush.msra.mxu0 %v2643_v6  ;;  %671 = vmatpush.msrb.mxu3 %v2856_v35 }
  0x3b   :  { %412 = vmatpush.msra.mxu1 %v2634_v5  ;;  %641 = vmatpush.msrb.mxu2 %v2863_v36 }
  0x3c   :  { %376 = vmatpush.msra.mxu0 %v2652_v7  ;;  %672 = vmatpush.msrb.mxu3 %v2868_v37 }
  0x3d   :  { %413 = vmatpush.msra.mxu1 %v2643_v6 }
  0x3e   :  { %377 = vmatpush.msra.mxu0 %v2661_v8 }
  0x3f   :  { %414 = vmatpush.msra.mxu1 %v2652_v7 }
  0x40   :  { %378 = vmatpush.msra.mxu0 %v2670_v9 }
  0x41   :  { %415 = vmatpush.msra.mxu1 %v2661_v8  ;;  %2285 = vmatmul.msk.f32.vlgmr.msra.gmra.mxu0 %vm52_vm0, %v2283_v26 }
  0x42   :  { %457 = vmatpush.msrb.mxu0 %v2823_v30 }
  0x43   :  { %416 = vmatpush.msra.mxu1 %v2670_v9 }
  0x44   :  { %2289 = vmatmul.msk.f32.vlgmr.msra.gmra.mxu1 %vm52_vm0, %v2287_v27  ;;  %458 = vmatpush.msrb.mxu0 %v2833_v32 }
  0x45   :  { %486 = vmatpush.msrb.mxu1 %v2828_v31 }
  0x46   :  { %588 = vmatpush.msra.mxu0 %v2823_v30 }
  0x47   :  { %487 = vmatpush.msrb.mxu1 %v2840_v33 }
  0x48   :  { %589 = vmatpush.msra.mxu0 %v2833_v32 }
  0x49   :  { %2286 = vmatmul.msk.f32.gmra.mxu0 %vm52_vm0, %v2284_v28  ;;  %611 = vmatpush.msra.mxu1 %v2828_v31 }
  0x4b   :  { %612 = vmatpush.msra.mxu1 %v2840_v33 }
  0x4c   :  { %2290 = vmatmul.msk.f32.gmra.mxu1 %vm52_vm0, %v2288_v29 }
  0x93   :  { %v76_v39 = vpop.f32.mrf.mxu0  ;;  %v114_v40 = vpop.f32.mrf.mxu1 }
  0x94   :  { %v77_v41 = vadd.f32 %v2879_v38, %v76_v39  ;;  %v115_v42 = vadd.f32 %v2879_v38, %v114_v40 }
  0x96   :  { %vm82_vm2 = vcmp.ge.f32.partialorder %v77_v41, 0.0  ;;  %v84_v43 = vmul.f32 0.01, %v77_v41  ;;  %vm120_vm3 = vcmp.ge.f32.partialorder %v115_v42, 0.0  ;;  %v122_v44 = vmul.f32 0.01, %v115_v42 }
  0x98   :  { %v124_v45 = vsel %vm120_vm3, %v115_v42, %v122_v44  ;;  %v86_v46 = vsel %vm82_vm2, %v77_v41, %v84_v43 }
  0x99   :  { %2293 = vmatmul.msk.f32.vlgmr.msrb.gmra.mxu0 %vm436_vm1, %v124_v45  ;;  %2295 = vmatmul.msk.f32.vlgmr.msrb.gmra.mxu1 %vm436_vm1, %v86_v46 }
  0x9a   :  { %v152_v47 = vpop.f32.mrf.mxu2  ;;  %v190_v48 = vpop.f32.mrf.mxu3  ;;  %706 = vmatpush.msrb.mxu0 %v2823_v30  ;;  %729 = vmatpush.msrb.mxu1 %v2828_v31 }
  0x9b   :  { %v153_v49 = vadd.f32 %v2879_v38, %v152_v47  ;;  %v191_v50 = vadd.f32 %v2879_v38, %v190_v48  ;;  %v117_v51 = vpop.f32.mrf.mxu1 }
  0x9c   :  { %v79_v52 = vpop.f32.mrf.mxu0  ;;  %v118_v53 = vadd.f32 %v2879_v38, %v117_v51  ;;  %707 = vmatpush.msrb.mxu0 %v2833_v32  ;;  %730 = vmatpush.msrb.mxu1 %v2840_v33 }
  0x9d   :  { %vm158_vm4 = vcmp.ge.f32.partialorder %v153_v49, 0.0  ;;  %v160_v54 = vmul.f32 0.01, %v153_v49  ;;  %vm196_vm5 = vcmp.ge.f32.partialorder %v191_v50, 0.0  ;;  %v198_v55 = vmul.f32 0.01, %v191_v50 }
  0x9e   :  { %v80_v56 = vadd.f32 %v2879_v38, %v79_v52  ;;  %vm121_vm6 = vcmp.ge.f32.partialorder %v118_v53, 0.0  ;;  %v123_v57 = vmul.f32 0.01, %v118_v53 }
  0x9f   :  { %v162_v58 = vsel %vm158_vm4, %v153_v49, %v160_v54  ;;  %v200_v59 = vsel %vm196_vm5, %v191_v50, %v198_v55 }
  0xa0   :  { %2299 = vmatmul.msk.f32.vlgmr.msra.gmra.mxu2 %vm436_vm1, %v162_v58  ;;  %2303 = vmatmul.msk.f32.vlgmr.msra.gmra.mxu3 %vm436_vm1, %v200_v59  ;;  %v125_v60 = vsel %vm121_vm6, %v118_v53, %v123_v57  ;;  %vm83_vm7 = vcmp.ge.f32.partialorder %v80_v56, 0.0  ;;  %v85_v61 = vmul.f32 0.01, %v80_v56 }
  0xa1   :  { %2294 = vmatmul.msk.f32.gmra.mxu0 %vm436_vm1, %v125_v60  ;;  %758 = vmatpush.msra.mxu2 %v2851_v34 }
  0xa2   :  { %v155_v62 = vpop.f32.mrf.mxu2  ;;  %v87_v63 = vsel %vm83_vm7, %v80_v56, %v85_v61  ;;  %789 = vmatpush.msra.mxu3 %v2856_v35 }
  0xa3   :  { %v156_v0 = vadd.f32 %v2879_v38, %v155_v62  ;;  %v193_v1 = vpop.f32.mrf.mxu3  ;;  %2296 = vmatmul.msk.f32.gmra.mxu1 %vm436_vm1, %v87_v63  ;;  %759 = vmatpush.msra.mxu2 %v2863_v36 }
  0xa4   :  { %v194_v2 = vadd.f32 %v2879_v38, %v193_v1  ;;  %790 = vmatpush.msra.mxu3 %v2868_v37 }
  0xa5   :  { %v161_v3 = vmul.f32 0.01, %v156_v0  ;;  %vm159_vm8 = vcmp.ge.f32.partialorder %v156_v0, 0.0 }
  0xa6   :  { %v199_v4 = vmul.f32 0.01, %v194_v2  ;;  %vm197_vm9 = vcmp.ge.f32.partialorder %v194_v2, 0.0 }
  0xa7   :  { %v163_v5 = vsel %vm159_vm8, %v156_v0, %v161_v3 }
  0xa8   :  { %v228_v6 = vpop.f32.mrf.mxu0  ;;  %2300 = vmatmul.msk.f32.gmra.mxu2 %vm436_vm1, %v163_v5  ;;  %v201_v7 = vsel %vm197_vm9, %v194_v2, %v199_v4 }
  0xa9   :  { %v229_v8 = vadd.f32 %v2879_v38, %v228_v6  ;;  %2304 = vmatmul.msk.f32.gmra.mxu3 %vm436_vm1, %v201_v7  ;;  %2305 = vmatmul.msk.f32.vlgmr.msra.gmra.mxu0 %vm436_vm1, %v200_v59 }
  0xaa   :  { %822 = vmatpush.msra.mxu0 %v2823_v30 }
  0xab   :  { %v236_v9 = vmul.f32 0.01, %v229_v8  ;;  %v266_v10 = vpop.f32.mrf.mxu1  ;;  %2307 = vmatmul.msk.f32.vlgmr.msra.gmra.mxu1 %vm436_vm1, %v162_v58  ;;  %vm234_vm10 = vcmp.ge.f32.partialorder %v229_v8, 0.0 }
  0xac   :  { %v267_v11 = vadd.f32 %v2879_v38, %v266_v10  ;;  %845 = vmatpush.msra.mxu1 %v2828_v31  ;;  %823 = vmatpush.msra.mxu0 %v2833_v32 }
  0xad   :  { %v238_v13 = vsel %vm234_vm10, %v229_v8, %v236_v9 }
  0xae   :  { %vm272_vm11 = vcmp.ge.f32.partialorder %v267_v11, 0.0  ;;  %v274_v12 = vmul.f32 0.01, %v267_v11  ;;  %846 = vmatpush.msra.mxu1 %v2840_v33 }
  0xb0   :  { %v231_v14 = vpop.f32.mrf.mxu0  ;;  %2309 = vmatmul.msk.f32.vlgmr.msrb.gmra.mxu2 %vm436_vm1, %v238_v13  ;;  %v276_v15 = vsel %vm272_vm11, %v267_v11, %v274_v12 }
  0xb1   :  { %v232_v16 = vadd.f32 %v2879_v38, %v231_v14  ;;  %2311 = vmatmul.msk.f32.vlgmr.msrb.gmra.mxu3 %vm436_vm1, %v276_v15  ;;  %2306 = vmatmul.msk.f32.gmra.mxu0 %vm436_vm1, %v201_v7 }
  0xb2   :  { %v304_v17 = vpop.f32.mrf.mxu2  ;;  %874 = vmatpush.msrb.mxu2 %v2851_v34  ;;  %905 = vmatpush.msrb.mxu3 %v2856_v35 }
  0xb3   :  { %v237_v18 = vmul.f32 0.01, %v232_v16  ;;  %v269_v19 = vpop.f32.mrf.mxu1  ;;  %2308 = vmatmul.msk.f32.gmra.mxu1 %vm436_vm1, %v163_v5  ;;  %v342_v20 = vpop.f32.mrf.mxu3  ;;  %vm235_vm12 = vcmp.ge.f32.partialorder %v232_v16, 0.0  ;;  %v305_v24 = vadd.f32 %v2879_v38, %v304_v17 }
  0xb4   :  { %v270_v21 = vadd.f32 %v2879_v38, %v269_v19  ;;  %875 = vmatpush.msrb.mxu2 %v2863_v36  ;;  %906 = vmatpush.msrb.mxu3 %v2868_v37  ;;  %v343_v23 = vadd.f32 %v2879_v38, %v342_v20 }
  0xb5   :  { %v239_v25 = vsel %vm235_vm12, %v232_v16, %v237_v18  ;;  %v312_v28 = vmul.f32 0.01, %v305_v24  ;;  %vm310_vm15 = vcmp.ge.f32.partialorder %v305_v24, 0.0  ;;  %v2956_v16 = vld [vmem:[%s3584_s5] ss:$0 sm:$0xff] }
  0xb6   :  { %v275_v22 = vmul.f32 0.01, %v270_v21  ;;  %vm273_vm13 = vcmp.ge.f32.partialorder %v270_v21, 0.0  ;;  %v350_v27 = vmul.f32 0.01, %v343_v23  ;;  %vm348_vm14 = vcmp.ge.f32.partialorder %v343_v23, 0.0 }
  0xb7   :  { %v314_v33 = vsel %vm310_vm15, %v305_v24, %v312_v28  ;;  %v957_v28 = vld [vmem:[%s3585_s6 + $0x38] sm:$0xff]  ;;  %vm987_vm15 = vcmask 261120  }
  0xb8   :  { %2310 = vmatmul.msk.f32.gmra.mxu2 %vm436_vm1, %v239_v25  ;;  %v277_v26 = vsel %vm273_vm13, %v270_v21, %v275_v22  ;;  %v352_v31 = vsel %vm348_vm14, %v343_v23, %v350_v27 }
  0xb9   :  { %2312 = vmatmul.msk.f32.gmra.mxu3 %vm436_vm1, %v277_v26  ;;  %2313 = vmatmul.msk.f32.vlgmr.msrb.gmra.mxu0 %vm436_vm1, %v276_v15 }
  0xba   :  { %v307_v30 = vpop.f32.mrf.mxu2 }
  0xbb   :  { %2315 = vmatmul.msk.f32.vlgmr.msrb.gmra.mxu1 %vm436_vm1, %v238_v13  ;;  %v345_v29 = vpop.f32.mrf.mxu3  ;;  %v308_v34 = vadd.f32 %v2879_v38, %v307_v30 }
  0xbc   :  { %v346_v32 = vadd.f32 %v2879_v38, %v345_v29 }
  0xbd   :  { %v313_v39 = vmul.f32 0.01, %v308_v34  ;;  %vm311_vm2 = vcmp.ge.f32.partialorder %v308_v34, 0.0 }
  0xbe   :  { %v351_v36 = vmul.f32 0.01, %v346_v32  ;;  %v380_v37 = vpop.f32.mrf.mxu0  ;;  %vm349_vm0 = vcmp.ge.f32.partialorder %v346_v32, 0.0 }
  0xbf   :  { %v381_v42 = vadd.f32 %v2879_v38, %v380_v37  ;;  %v315_v43 = vsel %vm311_vm2, %v308_v34, %v313_v39  ;;  %vm2235_vm2 = vcmask 41984  }
  0xc0   :  { %2317 = vmatmul.msk.f32.vlgmr.msra.gmra.mxu2 %vm436_vm1, %v314_v33  ;;  %v353_v40 = vsel %vm349_vm0, %v346_v32, %v351_v36  ;;  %v955_v32 = vld [vmem:[%s3585_s6 + $0x28] sm:$0xff] }
  0xc1   :  { %2319 = vmatmul.msk.f32.vlgmr.msra.gmra.mxu3 %vm436_vm1, %v352_v31  ;;  %2314 = vmatmul.msk.f32.gmra.mxu0 %vm436_vm1, %v277_v26  ;;  %v418_v35 = vpop.f32.mrf.mxu1  ;;  %v388_v45 = vmul.f32 0.01, %v381_v42  ;;  %vm386_vm4 = vcmp.ge.f32.partialorder %v381_v42, 0.0 }
  0xc2   :  { %v419_v41 = vadd.f32 %v2879_v38, %v418_v35  ;;  %1066 = vmatpush.msra.mxu3 %v957_v28 }
  0xc3   :  { %2316 = vmatmul.msk.f32.gmra.mxu1 %vm436_vm1, %v239_v25  ;;  %v390_v50 = vsel %vm386_vm4, %v381_v42, %v388_v45  ;;  %v951_v42 = vld [vmem:[%s3585_s6 + $0x8] sm:$0xff]  ;;  %v2982_v45 = vld [vmem:[%s3580_s1] sm:$0x3] }
  0xc4   :  { %v426_v44 = vmul.f32 0.01, %v419_v41  ;;  %vm424_vm3 = vcmp.ge.f32.partialorder %v419_v41, 0.0  ;;  %1067 = vmatpush.msra.mxu3 %v955_v32 }
  0xc6   :  { %v383_v47 = vpop.f32.mrf.mxu0  ;;  %v428_v48 = vsel %vm424_vm3, %v419_v41, %v426_v44 }
  0xc7   :  { %v384_v51 = vadd.f32 %v2879_v38, %v383_v47  ;;  %v2335_v47 = vld [vmem:[%s3585_s6 + $0x60] sm:$0xff] }
  0xc8   :  { %2318 = vmatmul.msk.f32.gmra.mxu2 %vm436_vm1, %v315_v43 }
  0xc9   :  { %2320 = vmatmul.msk.f32.gmra.mxu3 %vm436_vm1, %v353_v40  ;;  %2321 = vmatmul.msk.f32.vlgmr.msra.gmra.mxu0 %vm436_vm1, %v352_v31  ;;  %v421_v46 = vpop.f32.mrf.mxu1  ;;  %v389_v53 = vmul.f32 0.01, %v384_v51  ;;  %vm387_vm6 = vcmp.ge.f32.partialorder %v384_v51, 0.0 }
  0xca   :  { %v422_v49 = vadd.f32 %v2879_v38, %v421_v46  ;;  %v2337_v46 = vld [vmem:[%s3585_s6 + $0x70] sm:$0xff] }
  0xcb   :  { %2323 = vmatmul.msk.f32.vlgmr.msra.gmra.mxu1 %vm436_vm1, %v314_v33  ;;  %v391_v55 = vsel %vm387_vm6, %v384_v51, %v389_v53  ;;  %v952_v53 = vld [vmem:[%s3585_s6 + $0x10] sm:$0xff] }
  0xcc   :  { %v427_v52 = vmul.f32 0.01, %v422_v49  ;;  %vm425_vm5 = vcmp.ge.f32.partialorder %v422_v49, 0.0 }
  0xce   :  { %v429_v54 = vsel %vm425_vm5, %v422_v49, %v427_v52  ;;  %v954_v49 = vld [vmem:[%s3585_s6 + $0x20] sm:$0xff]  ;;  %v2333_v52 = vld [vmem:[%s3585_s6 + $0x50] sm:$0xff] }
  0xd0   :  { %2325 = vmatmul.msk.f32.vlgmr.msrb.gmra.mxu2 %vm436_vm1, %v390_v50 }
  0xd1   :  { %2327 = vmatmul.msk.f32.vlgmr.msrb.gmra.mxu3 %vm436_vm1, %v428_v48  ;;  %2322 = vmatmul.msk.f32.gmra.mxu0 %vm436_vm1, %v353_v40  ;;  %v953_v40 = vld [vmem:[%s3585_s6 + $0x18] sm:$0xff]  ;;  %v956_v48 = vld [vmem:[%s3585_s6 + $0x30] sm:$0xff] }
  0xd2   :  { %1068 = vmatpush.msra.mxu3 %v953_v40  ;;  %1046 = vmatpush.msra.mxu2 %v956_v48  ;;  %v2356_v40 = vld [vmem:[%s3585_s6 + $0xc0] sm:$0xff] }
  0xd3   :  { %2324 = vmatmul.msk.f32.gmra.mxu1 %vm436_vm1, %v315_v43  ;;  %v2349_v48 = vld [vmem:[%s3585_s6 + $0xa0] sm:$0xff] }
  0xd4   :  { %1069 = vmatpush.msra.mxu3 %v951_v42  ;;  %1047 = vmatpush.msra.mxu2 %v954_v49  ;;  %v2375_v42 = vld [vmem:[%s3585_s6 + $0x138] sm:$0xff]  ;;  %v2347_v49 = vld [vmem:[%s3585_s6 + $0x90] sm:$0xff] }
  0xd6   :  { %1048 = vmatpush.msra.mxu2 %v952_v53  ;;  %v2359_v53 = vld [vmem:[%s3585_s6 + $0xd8] sm:$0xff] }
  0xd8   :  { %2326 = vmatmul.msk.f32.gmra.mxu2 %vm436_vm1, %v391_v55 }
  0xd9   :  { %2328 = vmatmul.msk.f32.gmra.mxu3 %vm436_vm1, %v429_v54 }
 0x116   :  { %v460_v56 = vpop.f32.mrf.mxu0  ;;  %v489_v38 = vpop.f32.mrf.mxu1 }
 0x117   :  { %v490_v6 = vadd.f32 %v489_v38, %v460_v56  ;;  %v2331_v56 = vld [vmem:[%s3585_s6 + $0x40] sm:$0xff] }
 0x118   :  { %v950_v38 = vld [vmem:[%s3585_s6] sm:$0xff] }
 0x119   :  { %1049 = vmatpush.msra.mxu2 %v950_v38 }
 0x11e   :  { %v463_v57 = vpop.f32.mrf.mxu0 }
 0x120   :  { %v492_v58 = vpop.f32.mrf.mxu1 }
 0x121   :  { %v493_v3 = vadd.f32 %v492_v58, %v463_v57  ;;  %v2352_v57 = vld [vmem:[%s3585_s6 + $0xb8] sm:$0xff]  ;;  %v2350_v58 = vld [vmem:[%s3585_s6 + $0xa8] sm:$0xff] }
 0x122   :  { %1143 = vmatpush.msrb.mxu2 %v2352_v57 }
 0x123   :  { %v521_v59 = vpop.f32.mrf.mxu2  ;;  %v555_v60 = vpop.f32.mrf.mxu3 }
 0x124   :  { %v527_v10 = vadd.f32 %v521_v59, %v490_v6  ;;  %1144 = vmatpush.msrb.mxu2 %v2350_v58  ;;  %v2366_v58 = vld [vmem:[%s3580_s1 + $0x4] sm:$0x3] }
 0x126   :  { %v591_v61 = vpop.f32.mrf.mxu0  ;;  %v561_v15 = vadd.f32 %v555_v60, %v527_v10 }
 0x128   :  { %v614_v62 = vpop.f32.mrf.mxu1  ;;  %v566_v23 = vadd.f32 %v2956_v16, %v561_v15 }
 0x129   :  { %v615_v4 = vadd.f32 %v614_v62, %v591_v61  ;;  %v2348_v62 = vld [vmem:[%s3585_s6 + $0x98] sm:$0xff] }
 0x12a   :  { %v570_v29 = vmul.f32 0.01, %v566_v23  ;;  %vm568_vm10 = vcmp.ge.f32.partialorder %v566_v23, 0.0  ;;  %1145 = vmatpush.msrb.mxu2 %v2348_v62  ;;  %v2370_v62 = vld [vmem:[%s3585_s6 + $0x110] sm:$0xff] }
 0x12b   :  { %v524_v63 = vpop.f32.mrf.mxu2 }
 0x12c   :  { %v558_v0 = vpop.f32.mrf.mxu3  ;;  %v528_v7 = vadd.f32 %v524_v63, %v493_v3  ;;  %v572_v43 = vsel %vm568_vm10, %v566_v23, %v570_v29  ;;  %v2338_v29 = vld [vmem:[%s3585_s6 + $0x78] sm:$0xff] }
 0x12e   :  { %v594_v1 = vpop.f32.mrf.mxu0  ;;  %v562_v11 = vadd.f32 %v558_v0, %v528_v7 }
 0x130   :  { %v617_v2 = vpop.f32.mrf.mxu1  ;;  %v567_v19 = vadd.f32 %v2956_v16, %v562_v11 }
 0x131   :  { %v618_v17 = vadd.f32 %v617_v2, %v594_v1 }
 0x132   :  { %v571_v25 = vmul.f32 0.01, %v567_v19  ;;  %vm569_vm7 = vcmp.ge.f32.partialorder %v567_v19, 0.0 }
 0x133   :  { %v643_v5 = vpop.f32.mrf.mxu2 }
 0x134   :  { %v649_v8 = vadd.f32 %v643_v5, %v615_v4  ;;  %v674_v9 = vpop.f32.mrf.mxu3  ;;  %v573_v35 = vsel %vm569_vm7, %v567_v19, %v571_v25 }
 0x136   :  { %v680_v12 = vadd.f32 %v674_v9, %v649_v8  ;;  %v2949_v13 = vpop.f32.mrf.mxu0 }
 0x138   :  { %v2951_v14 = vpop.f32.mrf.mxu1  ;;  %v682_v20 = vadd.f32 %v2956_v16, %v680_v12 }
 0x139   :  { %v733_v63 = vadd.f32 %v2951_v14, %v2949_v13 }
 0x13a   :  { %v686_v26 = vmul.f32 0.01, %v682_v20  ;;  %vm684_vm8 = vcmp.ge.f32.partialorder %v682_v20, 0.0 }
 0x13b   :  { %v646_v18 = vpop.f32.mrf.mxu2 }
 0x13c   :  { %v650_v21 = vadd.f32 %v646_v18, %v618_v17  ;;  %v677_v22 = vpop.f32.mrf.mxu3  ;;  %v688_v36 = vsel %vm684_vm8, %v682_v20, %v686_v26 }
 0x13d   :  { %v2976_v44 = vmax.f32 %v572_v43, %v688_v36  ;;  %v2373_v43 = vld [vmem:[%s3585_s6 + $0x128] sm:$0xff] }
 0x13e   :  { %v681_v24 = vadd.f32 %v677_v22, %v650_v21  ;;  %v712_v31 = vpop.f32.mrf.mxu0 }
 0x140   :  { %v683_v27 = vadd.f32 %v2956_v16, %v681_v24  ;;  %v735_v33 = vpop.f32.mrf.mxu1 }
 0x141   :  { %v736_v59 = vadd.f32 %v735_v33, %v712_v31  ;;  %v2334_v31 = vld [vmem:[%s3585_s6 + $0x58] sm:$0xff]  ;;  %v2332_v33 = vld [vmem:[%s3585_s6 + $0x48] sm:$0xff] }
 0x142   :  { %vm685_vm9 = vcmp.ge.f32.partialorder %v683_v27, 0.0  ;;  %v687_v30 = vmul.f32 0.01, %v683_v27 }
 0x143   :  { %v761_v34 = vpop.f32.mrf.mxu2 }
 0x144   :  { %v689_v37 = vsel %vm685_vm9, %v683_v27, %v687_v30  ;;  %v792_v39 = vpop.f32.mrf.mxu3  ;;  %v767_v3 = vadd.f32 %v761_v34, %v733_v63  ;;  %v2336_v30 = vld [vmem:[%s3585_s6 + $0x68] sm:$0xff]  ;;  %v2343_v34 = vld [vmem:[%s3580_s1 + $0x2] sm:$0x3] }
 0x145   :  { %v2971_v41 = vmax.f32 %v573_v35, %v689_v37  ;;  %v2362_v35 = vld [vmem:[%s3585_s6 + $0xf0] sm:$0xff]  ;;  %v2360_v37 = vld [vmem:[%s3585_s6 + $0xe0] sm:$0xff] }
 0x146   :  { %v825_v54 = vpop.f32.mrf.mxu0  ;;  %v798_v8 = vadd.f32 %v792_v39, %v767_v3  ;;  %v2358_v39 = vld [vmem:[%s3585_s6 + $0xd0] sm:$0xff]  ;;  %v2383_v63 = vld [vmem:[%s3585_s6 + $0x160] sm:$0xff] }
 0x147   :  { %944 = vmatpush.msrb.mxu0 %v2971_v41  ;;  %v2379_v3 = vld [vmem:[%s3585_s6 + $0x140] sm:$0xff] }
 0x148   :  { %v848_v55 = vpop.f32.mrf.mxu1  ;;  %v800_v15 = vadd.f32 %v2956_v16, %v798_v8  ;;  %v2380_v8 = vld [vmem:[%s3585_s6 + $0x148] sm:$0xff] }
 0x149   :  { %945 = vmatpush.msrb.mxu0 %v2976_v44  ;;  %v849_v60 = vadd.f32 %v848_v55, %v825_v54  ;;  %v2357_v55 = vld [vmem:[%s3585_s6 + $0xc8] sm:$0xff] }
 0x14a   :  { %2329 = vmatmul.msk.f32.vlgmr.msrb.gmra.mxu0 %vm436_vm1, %v2982_v45  ;;  %v804_v21 = vmul.f32 0.01, %v800_v15  ;;  %vm802_vm14 = vcmp.ge.f32.partialorder %v800_v15, 0.0 }
 0x14b   :  { %1003 = vmatpush.msra.mxu0 %v2337_v46  ;;  %v764_v50 = vpop.f32.mrf.mxu2  ;;  %v2369_v46 = vld [vmem:[%s3585_s6 + $0x108] sm:$0xff] }
 0x14c   :  { %v795_v51 = vpop.f32.mrf.mxu3  ;;  %v768_v0 = vadd.f32 %v764_v50, %v736_v59  ;;  %v806_v27 = vsel %vm802_vm14, %v800_v15, %v804_v21  ;;  %v2345_v50 = vld [vmem:[%s3585_s6 + $0x80] sm:$0xff]  ;;  %v2374_v59 = vld [vmem:[%s3585_s6 + $0x130] sm:$0xff] }
 0x14d   :  { %1004 = vmatpush.msra.mxu0 %v2335_v47  ;;  %v2351_v47 = vld [vmem:[%s3585_s6 + $0xb0] sm:$0xff]  ;;  %v2395_v15 = vld [vmem:[%s3585_s6 + $0x1a0] sm:$0xff] }
 0x14e   :  { %v828_v4 = vpop.f32.mrf.mxu0  ;;  %v799_v6 = vadd.f32 %v795_v51, %v768_v0  ;;  %v2363_v51 = vld [vmem:[%s3585_s6 + $0xf8] sm:$0xff]  ;;  %v2368_v0 = vld [vmem:[%s3585_s6 + $0x100] sm:$0xff] }
 0x14f   :  { %1005 = vmatpush.msra.mxu0 %v2333_v52  ;;  %v2361_v52 = vld [vmem:[%s3585_s6 + $0xe8] sm:$0xff] }
 0x150   :  { %v851_v5 = vpop.f32.mrf.mxu1  ;;  %v801_v11 = vadd.f32 %v2956_v16, %v799_v6  ;;  %v2382_v6 = vld [vmem:[%s3585_s6 + $0x158] sm:$0xff] }
 0x151   :  { %1006 = vmatpush.msra.mxu0 %v2331_v56  ;;  %v852_v9 = vadd.f32 %v851_v5, %v828_v4  ;;  %v2384_v4 = vld [vmem:[%s3585_s6 + $0x168] sm:$0xff]  ;;  %v2398_v5 = vld [vmem:[%s3585_s6 + $0x1b8] sm:$0xff] }
 0x152   :  { %v805_v18 = vmul.f32 0.01, %v801_v11  ;;  %vm803_vm11 = vcmp.ge.f32.partialorder %v801_v11, 0.0 }
 0x153   :  { %1093 = vmatpush.msrb.mxu0 %v2971_v41  ;;  %v877_v61 = vpop.f32.mrf.mxu2 }
 0x154   :  { %v883_v1 = vadd.f32 %v877_v61, %v849_v60  ;;  %v908_v2 = vpop.f32.mrf.mxu3  ;;  %v807_v23 = vsel %vm803_vm11, %v801_v11, %v805_v18  ;;  %v2372_v60 = vld [vmem:[%s3585_s6 + $0x120] sm:$0xff]  ;;  %v2385_v61 = vld [vmem:[%s3585_s6 + $0x170] sm:$0xff] }
 0x155   :  { %1094 = vmatpush.msrb.mxu0 %v2976_v44 }
 0x156   :  { %v914_v7 = vadd.f32 %v908_v2, %v883_v1  ;;  %v2381_v1 = vld [vmem:[%s3585_s6 + $0x150] sm:$0xff]  ;;  %v2386_v2 = vld [vmem:[%s3585_s6 + $0x178] sm:$0xff] }
 0x158   :  { %v916_v12 = vadd.f32 %v2956_v16, %v914_v7  ;;  %v2396_v7 = vld [vmem:[%s3585_s6 + $0x1a8] sm:$0xff] }
 0x15a   :  { %v920_v19 = vmul.f32 0.01, %v916_v12  ;;  %vm918_vm12 = vcmp.ge.f32.partialorder %v916_v12, 0.0 }
 0x15b   :  { %v880_v10 = vpop.f32.mrf.mxu2 }
 0x15c   :  { %v884_v13 = vadd.f32 %v880_v10, %v852_v9  ;;  %v911_v14 = vpop.f32.mrf.mxu3  ;;  %v922_v24 = vsel %vm918_vm12, %v916_v12, %v920_v19  ;;  %v2394_v9 = vld [vmem:[%s3585_s6 + $0x198] sm:$0xff]  ;;  %v2392_v10 = vld [vmem:[%s3585_s6 + $0x188] sm:$0xff]  ;;  %v2393_v19 = vld [vmem:[%s3585_s6 + $0x190] sm:$0xff] }
 0x15d   :  { %v3030_v28 = vmax.f32 %v806_v27, %v922_v24 }
 0x15e   :  { %v915_v17 = vadd.f32 %v911_v14, %v884_v13  ;;  %v2397_v14 = vld [vmem:[%s3585_s6 + $0x1b0] sm:$0xff] }
 0x160   :  { %v917_v20 = vadd.f32 %v2956_v16, %v915_v17  ;;  %v2346_v16 = vld [vmem:[%s3585_s6 + $0x88] sm:$0xff] }
 0x161   :  { %1146 = vmatpush.msrb.mxu2 %v2346_v16  ;;  %v2389_v16 = vld [vmem:[%s3580_s1 + $0x6] sm:$0x3] }
 0x162   :  { %vm919_vm13 = vcmp.ge.f32.partialorder %v917_v20, 0.0  ;;  %v921_v22 = vmul.f32 0.01, %v917_v20 }
 0x164   :  { %v923_v25 = vsel %vm919_vm13, %v917_v20, %v921_v22 }
 0x165   :  { %v3028_v26 = vmax.f32 %v807_v23, %v923_v25 }
 0x167   :  { %972 = vmatpush.msrb.mxu1 %v3028_v26  ;;  %1167 = vmatpush.msrb.mxu3 %v3028_v26 }
 0x169   :  { %973 = vmatpush.msrb.mxu1 %v3030_v28  ;;  %1168 = vmatpush.msrb.mxu3 %v3030_v28 }
 0x16a   :  { %2330 = vmatmul.msk.f32.vlgmr.msrb.gmra.mxu1 %vm436_vm1, %v2982_v45  ;;  %v2371_v45 = vld [vmem:[%s3585_s6 + $0x118] sm:$0xff] }
 0x16b   :  { %1023 = vmatpush.msra.mxu1 %v2338_v29  ;;  %v2391_v29 = vld [vmem:[%s3585_s6 + $0x180] sm:$0xff] }
 0x16d   :  { %1024 = vmatpush.msra.mxu1 %v2336_v30  ;;  %v2409_v30 = vld [vmem:[%s3585_s6 + $0x1f8] sm:$0xff] }
 0x16f   :  { %1025 = vmatpush.msra.mxu1 %v2334_v31  ;;  %v2407_v31 = vld [vmem:[%s3585_s6 + $0x1e8] sm:$0xff] }
 0x171   :  { %1026 = vmatpush.msra.mxu1 %v2332_v33  ;;  %v2403_v33 = vld [vmem:[%s3585_s6 + $0x1c8] sm:$0xff] }
 0x173   :  { %1123 = vmatpush.msrb.mxu1 %v2351_v47 }
 0x175   :  { %1124 = vmatpush.msrb.mxu1 %v2349_v48 }
 0x177   :  { %1125 = vmatpush.msrb.mxu1 %v2347_v49 }
 0x179   :  { %1126 = vmatpush.msrb.mxu1 %v2345_v50 }
 0x1c7   :  { %v947_v32 = vpop.f32.mrf.mxu0 }
 0x1c8   :  { %2341 = vmatmul.msk.f32.vlgmr.msra.gmra.mxu2 %vm987_vm15, %v947_v32  ;;  %2342 = vmatmul.msk.f32.vlgmr.msra.gmra.mxu3 %vm987_vm15, %v947_v32  ;;  %v2405_v32 = vld [vmem:[%s3585_s6 + $0x1d8] sm:$0xff] }
 0x1c9   :  { %1246 = vmatpush.msra.mxu2 %v2971_v41  ;;  %1276 = vmatpush.msra.mxu3 %v2374_v59  ;;  %v2432_v59 = vld [vmem:[%s3585_s6 + $0x278] sm:$0xff] }
 0x1cb   :  { %1247 = vmatpush.msra.mxu2 %v2976_v44  ;;  %1277 = vmatpush.msra.mxu3 %v2372_v60  ;;  %v2431_v60 = vld [vmem:[%s3585_s6 + $0x270] sm:$0xff] }
 0x1cd   :  { %1278 = vmatpush.msra.mxu3 %v2370_v62  ;;  %v2429_v62 = vld [vmem:[%s3585_s6 + $0x260] sm:$0xff] }
 0x1cf   :  { %1279 = vmatpush.msra.mxu3 %v2368_v0  ;;  %v2428_v0 = vld [vmem:[%s3585_s6 + $0x258] sm:$0xff] }
 0x1d0   :  { %2355 = vmatmul.msk.f32.vlgmr.msrb.gmra.mxu3 %vm436_vm1, %v2343_v34 }
 0x1d1   :  { %1370 = vmatpush.msrb.mxu3 %v2386_v2  ;;  %v2425_v2 = vld [vmem:[%s3585_s6 + $0x240] sm:$0xff] }
 0x1d3   :  { %1371 = vmatpush.msrb.mxu3 %v2384_v4  ;;  %v2442_v4 = vld [vmem:[%s3585_s6 + $0x2a8] sm:$0xff] }
 0x1d5   :  { %1372 = vmatpush.msrb.mxu3 %v2382_v6  ;;  %v2438_v6 = vld [vmem:[%s3585_s6 + $0x288] sm:$0xff] }
 0x1d7   :  { %1373 = vmatpush.msrb.mxu3 %v2380_v8 }
 0x1e7   :  { %v975_v36 = vpop.f32.mrf.mxu1 }
 0x1e8   :  { %2339 = vmatmul.msk.f32.vlgmr.msra.gmra.mxu0 %vm987_vm15, %v975_v36  ;;  %2340 = vmatmul.msk.f32.vlgmr.msra.gmra.mxu1 %vm987_vm15, %v975_v36  ;;  %v2404_v36 = vld [vmem:[%s3585_s6 + $0x1d0] sm:$0xff] }
 0x1e9   :  { %1197 = vmatpush.msra.mxu0 %v2362_v35  ;;  %1217 = vmatpush.msra.mxu1 %v2363_v51  ;;  %v2406_v35 = vld [vmem:[%s3585_s6 + $0x1e0] sm:$0xff] }
 0x1eb   :  { %1198 = vmatpush.msra.mxu0 %v2360_v37  ;;  %1218 = vmatpush.msra.mxu1 %v2361_v52  ;;  %v2402_v37 = vld [vmem:[%s3585_s6 + $0x1c0] sm:$0xff] }
 0x1ed   :  { %1199 = vmatpush.msra.mxu0 %v2358_v39  ;;  %1219 = vmatpush.msra.mxu1 %v2359_v53  ;;  %v2421_v39 = vld [vmem:[%s3585_s6 + $0x238] sm:$0xff]  ;;  %v2412_v53 = vld [vmem:[%s3580_s1 + $0x8] sm:$0x3] }
 0x1ef   :  { %1200 = vmatpush.msra.mxu0 %v2356_v40  ;;  %1220 = vmatpush.msra.mxu1 %v2357_v55  ;;  %v2419_v40 = vld [vmem:[%s3585_s6 + $0x228] sm:$0xff] }
 0x1f0   :  { %2344 = vmatmul.msk.f32.vlgmr.msrb.gmra.mxu0 %vm436_vm1, %v2343_v34  ;;  %v2408_v34 = vld [vmem:[%s3585_s6 + $0x1f0] sm:$0xff] }
 0x1f1   :  { %1296 = vmatpush.msrb.mxu0 %v2375_v42  ;;  %v2417_v42 = vld [vmem:[%s3585_s6 + $0x218] sm:$0xff] }
 0x1f3   :  { %1297 = vmatpush.msrb.mxu0 %v2373_v43  ;;  %v2415_v43 = vld [vmem:[%s3585_s6 + $0x208] sm:$0xff] }
 0x1f5   :  { %1298 = vmatpush.msrb.mxu0 %v2371_v45 }
 0x1f7   :  { %1299 = vmatpush.msrb.mxu0 %v2369_v46 }
 0x24b   :  { %v1071_v54 = vpop.f32.mrf.mxu3  ;;  %v1051_v12 = vpop.f32.mrf.mxu2 }
 0x253   :  { %v1170_v56 = vpop.f32.mrf.mxu3 }
 0x254   :  { %2364 = vmatmul.msk.f32.vlgmr.msra.gmra.mxu0 %vm987_vm15, %v1170_v56 }
 0x255   :  { %1399 = vmatpush.msra.mxu0 %v2971_v41 }
 0x257   :  { %1400 = vmatpush.msra.mxu0 %v2976_v44 }
 0x265   :  { %v1008_v38 = vpop.f32.mrf.mxu0  ;;  %v1028_v11 = vpop.f32.mrf.mxu1 }
 0x266   :  { %v1052_v13 = vadd.f32 %v1051_v12, %v1008_v38  ;;  %v1072_v20 = vadd.f32 %v1071_v54, %v1028_v11  ;;  %v2418_v38 = vld [vmem:[%s3585_s6 + $0x220] sm:$0xff] }
 0x267   :  { %v2441_v11 = vld [vmem:[%s3585_s6 + $0x2a0] sm:$0xff] }
 0x26d   :  { %v1096_v57 = vpop.f32.mrf.mxu0 }
 0x26e   :  { %2353 = vmatmul.msk.f32.vlgmr.msrb.gmra.mxu1 %vm987_vm15, %v1096_v57  ;;  %2354 = vmatmul.msk.f32.vlgmr.msrb.gmra.mxu2 %vm987_vm15, %v1096_v57  ;;  %v2416_v57 = vld [vmem:[%s3585_s6 + $0x210] sm:$0xff] }
 0x26f   :  { %1320 = vmatpush.msrb.mxu1 %v3028_v26  ;;  %1350 = vmatpush.msrb.mxu2 %v2385_v61  ;;  %v2430_v61 = vld [vmem:[%s3585_s6 + $0x268] sm:$0xff] }
 0x271   :  { %1321 = vmatpush.msrb.mxu1 %v3030_v28  ;;  %1351 = vmatpush.msrb.mxu2 %v2383_v63  ;;  %v2427_v63 = vld [vmem:[%s3585_s6 + $0x250] sm:$0xff] }
 0x273   :  { %1352 = vmatpush.msrb.mxu2 %v2381_v1  ;;  %v2426_v1 = vld [vmem:[%s3585_s6 + $0x248] sm:$0xff] }
 0x275   :  { %1353 = vmatpush.msrb.mxu2 %v2379_v3  ;;  %v2444_v3 = vld [vmem:[%s3585_s6 + $0x2b8] sm:$0xff] }
 0x276   :  { %2365 = vmatmul.msk.f32.vlgmr.msra.gmra.mxu1 %vm987_vm15, %v1170_v56  ;;  %2367 = vmatmul.msk.f32.vlgmr.msra.gmra.mxu2 %vm436_vm1, %v2366_v58  ;;  %v2420_v56 = vld [vmem:[%s3585_s6 + $0x230] sm:$0xff] }
 0x277   :  { %1449 = vmatpush.msra.mxu2 %v2398_v5  ;;  %1429 = vmatpush.msra.mxu1 %v2397_v14  ;;  %v2440_v5 = vld [vmem:[%s3585_s6 + $0x298] sm:$0xff] }
 0x279   :  { %1450 = vmatpush.msra.mxu2 %v2396_v7  ;;  %1430 = vmatpush.msra.mxu1 %v2395_v15 }
 0x27b   :  { %1451 = vmatpush.msra.mxu2 %v2394_v9  ;;  %1431 = vmatpush.msra.mxu1 %v2393_v19 }
 0x27d   :  { %1452 = vmatpush.msra.mxu2 %v2392_v10  ;;  %1432 = vmatpush.msra.mxu1 %v2391_v29  ;;  %v2443_v10 = vld [vmem:[%s3585_s6 + $0x2b0] sm:$0xff]  ;;  %v2452_v29 = vld [vmem:[%s3585_s6 + $0x2e0] sm:$0xff] }
 0x27e   :  { %2378 = vmatmul.msk.f32.vlgmr.msrb.gmra.mxu1 %vm436_vm1, %v2366_v58  ;;  %v2414_v58 = vld [vmem:[%s3585_s6 + $0x200] sm:$0xff] }
 0x27f   :  { %1523 = vmatpush.msrb.mxu1 %v2409_v30  ;;  %v2450_v30 = vld [vmem:[%s3585_s6 + $0x2d0] sm:$0xff] }
 0x281   :  { %1524 = vmatpush.msrb.mxu1 %v2407_v31  ;;  %v2448_v31 = vld [vmem:[%s3585_s6 + $0x2c0] sm:$0xff] }
 0x283   :  { %1525 = vmatpush.msrb.mxu1 %v2405_v32  ;;  %v2467_v32 = vld [vmem:[%s3585_s6 + $0x338] sm:$0xff] }
 0x285   :  { %1526 = vmatpush.msrb.mxu1 %v2403_v33  ;;  %v2465_v33 = vld [vmem:[%s3585_s6 + $0x328] sm:$0xff] }
 0x2d1   :  { %v1202_v45 = vpop.f32.mrf.mxu0 }
 0x2eb   :  { %v1128_v17 = vpop.f32.mrf.mxu1 }
 0x2ec   :  { %v1151_v18 = vadd.f32 %v1128_v17, %v1052_v13  ;;  %v2439_v13 = vld [vmem:[%s3585_s6 + $0x290] sm:$0xff] }
 0x2ee   :  { %v1225_v48 = vadd.f32 %v1202_v45, %v1151_v18 }
 0x2f1   :  { %v1148_v21 = vpop.f32.mrf.mxu2 }
 0x2f2   :  { %v1152_v22 = vadd.f32 %v1148_v21, %v1072_v20  ;;  %v2435_v20 = vld [vmem:[%s3580_s1 + $0xa] sm:$0x3] }
 0x2f3   :  { %v1222_v23 = vpop.f32.mrf.mxu1 }
 0x2f4   :  { %v1226_v24 = vadd.f32 %v1222_v23, %v1152_v22  ;;  %v2437_v22 = vld [vmem:[%s3585_s6 + $0x280] sm:$0xff]  ;;  %v2455_v23 = vld [vmem:[%s3585_s6 + $0x2f8] sm:$0xff] }
 0x2f9   :  { %v1249_v25 = vpop.f32.mrf.mxu2 }
 0x2fa   :  { %2376 = vmatmul.msk.f32.vlgmr.msra.gmra.mxu3 %vm987_vm15, %v1249_v25  ;;  %2377 = vmatmul.msk.f32.vlgmr.msrb.gmra.mxu0 %vm987_vm15, %v1249_v25  ;;  %v2451_v25 = vld [vmem:[%s3585_s6 + $0x2d8] sm:$0xff] }
 0x2fb   :  { %1473 = vmatpush.msra.mxu3 %v3028_v26  ;;  %v1323_v27 = vpop.f32.mrf.mxu1  ;;  %1503 = vmatpush.msrb.mxu0 %v2408_v34  ;;  %v2463_v34 = vld [vmem:[%s3585_s6 + $0x318] sm:$0xff] }
 0x2fc   :  { %2387 = vmatmul.msk.f32.vlgmr.msrb.gmra.mxu2 %vm987_vm15, %v1323_v27 }
 0x2fd   :  { %1474 = vmatpush.msra.mxu3 %v3030_v28  ;;  %1552 = vmatpush.msrb.mxu2 %v2971_v41 }
 0x2fe   :  { %1504 = vmatpush.msrb.mxu0 %v2406_v35  ;;  %v2461_v35 = vld [vmem:[%s3585_s6 + $0x308] sm:$0xff] }
 0x2ff   :  { %1553 = vmatpush.msrb.mxu2 %v2976_v44 }
 0x300   :  { %1505 = vmatpush.msrb.mxu0 %v2404_v36 }
 0x302   :  { %2388 = vmatmul.msk.f32.vlgmr.msrb.gmra.mxu3 %vm987_vm15, %v1323_v27  ;;  %2390 = vmatmul.msk.f32.vlgmr.msra.gmra.mxu0 %vm436_vm1, %v2389_v16  ;;  %v2449_v27 = vld [vmem:[%s3585_s6 + $0x2c8] sm:$0xff] }
 0x303   :  { %1506 = vmatpush.msrb.mxu0 %v2402_v37  ;;  %1582 = vmatpush.msrb.mxu3 %v2420_v56  ;;  %v2477_v56 = vld [vmem:[%s3585_s6 + $0x370] sm:$0xff] }
 0x305   :  { %1602 = vmatpush.msra.mxu0 %v2421_v39  ;;  %1583 = vmatpush.msrb.mxu3 %v2418_v38  ;;  %v2475_v38 = vld [vmem:[%s3585_s6 + $0x360] sm:$0xff] }
 0x307   :  { %1603 = vmatpush.msra.mxu0 %v2419_v40  ;;  %1584 = vmatpush.msrb.mxu3 %v2416_v57  ;;  %v2473_v57 = vld [vmem:[%s3585_s6 + $0x350] sm:$0xff] }
 0x309   :  { %1604 = vmatpush.msra.mxu0 %v2417_v42  ;;  %1585 = vmatpush.msrb.mxu3 %v2414_v58  ;;  %v2471_v58 = vld [vmem:[%s3585_s6 + $0x340] sm:$0xff] }
 0x30a   :  { %2401 = vmatmul.msk.f32.vlgmr.msra.gmra.mxu3 %vm436_vm1, %v2389_v16  ;;  %v2454_v16 = vld [vmem:[%s3585_s6 + $0x2f0] sm:$0xff] }
 0x30b   :  { %1605 = vmatpush.msra.mxu0 %v2415_v43  ;;  %1676 = vmatpush.msra.mxu3 %v2432_v59 }
 0x30d   :  { %1677 = vmatpush.msra.mxu3 %v2430_v61 }
 0x30f   :  { %1678 = vmatpush.msra.mxu3 %v2428_v0 }
 0x311   :  { %1679 = vmatpush.msra.mxu3 %v2426_v1 }
 0x377   :  { %v1301_v46 = vpop.f32.mrf.mxu0 }
 0x378   :  { %v1305_v47 = vadd.f32 %v1301_v46, %v1226_v24  ;;  %v2453_v24 = vld [vmem:[%s3585_s6 + $0x2e8] sm:$0xff] }
 0x37d   :  { %v1281_v49 = vpop.f32.mrf.mxu3 }
 0x37e   :  { %v1304_v50 = vadd.f32 %v1281_v49, %v1225_v48 }
 0x37f   :  { %v1402_v51 = vpop.f32.mrf.mxu0  ;;  %v1355_v7 = vpop.f32.mrf.mxu2 }
 0x380   :  { %2399 = vmatmul.msk.f32.vlgmr.msra.gmra.mxu1 %vm987_vm15, %v1402_v51  ;;  %2400 = vmatmul.msk.f32.vlgmr.msra.gmra.mxu2 %vm987_vm15, %v1402_v51  ;;  %v1378_v8 = vadd.f32 %v1355_v7, %v1304_v50  ;;  %v2466_v50 = vld [vmem:[%s3585_s6 + $0x330] sm:$0xff]  ;;  %v2464_v51 = vld [vmem:[%s3585_s6 + $0x320] sm:$0xff]  ;;  %v2488_v7 = vld [vmem:[%s3585_s6 + $0x3a8] sm:$0xff] }
 0x381   :  { %1626 = vmatpush.msra.mxu1 %v3028_v26  ;;  %1656 = vmatpush.msra.mxu2 %v2431_v60 }
 0x383   :  { %1627 = vmatpush.msra.mxu1 %v3030_v28  ;;  %1657 = vmatpush.msra.mxu2 %v2429_v62 }
 0x385   :  { %v1375_v52 = vpop.f32.mrf.mxu3  ;;  %1658 = vmatpush.msra.mxu2 %v2427_v63 }
 0x386   :  { %v1379_v54 = vadd.f32 %v1375_v52, %v1305_v47  ;;  %v2458_v47 = vld [vmem:[%s3580_s1 + $0xc] sm:$0x3]  ;;  %v2462_v52 = vld [vmem:[%s3585_s6 + $0x310] sm:$0xff] }
 0x387   :  { %1659 = vmatpush.msra.mxu2 %v2425_v2 }
 0x388   :  { %2413 = vmatmul.msk.f32.vlgmr.msrb.gmra.mxu2 %vm436_vm1, %v2412_v53 }
 0x389   :  { %1755 = vmatpush.msrb.mxu2 %v2444_v3 }
 0x38b   :  { %1756 = vmatpush.msrb.mxu2 %v2442_v4  ;;  %v2481_v4 = vld [vmem:[%s3580_s1 + $0xe] sm:$0x3] }
 0x38d   :  { %v1476_v55 = vpop.f32.mrf.mxu3  ;;  %1757 = vmatpush.msrb.mxu2 %v2440_v5 }
 0x38e   :  { %2410 = vmatmul.msk.f32.vlgmr.msrb.gmra.mxu0 %vm987_vm15, %v1476_v55  ;;  %2411 = vmatmul.msk.f32.vlgmr.msrb.gmra.mxu1 %vm987_vm15, %v1476_v55  ;;  %v2472_v55 = vld [vmem:[%s3585_s6 + $0x348] sm:$0xff] }
 0x38f   :  { %1705 = vmatpush.msrb.mxu0 %v2971_v41  ;;  %1758 = vmatpush.msrb.mxu2 %v2438_v6  ;;  %v2489_v6 = vld [vmem:[%s3585_s6 + $0x3b0] sm:$0xff] }
 0x390   :  { %1735 = vmatpush.msrb.mxu1 %v2443_v10  ;;  %v2483_v10 = vld [vmem:[%s3585_s6 + $0x380] sm:$0xff] }
 0x391   :  { %1706 = vmatpush.msrb.mxu0 %v2976_v44 }
 0x392   :  { %1736 = vmatpush.msrb.mxu1 %v2441_v11  ;;  %v2484_v11 = vld [vmem:[%s3585_s6 + $0x388] sm:$0xff] }
 0x394   :  { %1737 = vmatpush.msrb.mxu1 %v2439_v13  ;;  %v2501_v13 = vld [vmem:[%s3585_s6 + $0x3f8] sm:$0xff] }
 0x396   :  { %2424 = vmatmul.msk.f32.vlgmr.msra.gmra.mxu1 %vm436_vm1, %v2412_v53  ;;  %v2476_v53 = vld [vmem:[%s3585_s6 + $0x368] sm:$0xff] }
 0x397   :  { %1738 = vmatpush.msrb.mxu1 %v2437_v22  ;;  %v2190_v22 = vld [vmem:[%s3587_s8 + $0xf8] sm:$0xff] }
 0x399   :  { %1829 = vmatpush.msra.mxu1 %v2455_v23  ;;  %v2173_v23 = vld [vmem:[%s3587_s8 + $0x70] sm:$0xff] }
 0x39b   :  { %1830 = vmatpush.msra.mxu1 %v2453_v24 }
 0x39d   :  { %1831 = vmatpush.msra.mxu1 %v2451_v25  ;;  %v2189_v25 = vld [vmem:[%s3587_s8 + $0xf0] sm:$0xff] }
 0x39f   :  { %1832 = vmatpush.msra.mxu1 %v2449_v27  ;;  %v2172_v27 = vld [vmem:[%s3587_s8 + $0x68] sm:$0xff] }
 0x3fd   :  { %v1434_v9 = vpop.f32.mrf.mxu1 }
 0x3fe   :  { %v1457_v12 = vadd.f32 %v1434_v9, %v1378_v8  ;;  %v2485_v8 = vld [vmem:[%s3585_s6 + $0x390] sm:$0xff]  ;;  %v2486_v9 = vld [vmem:[%s3585_s6 + $0x398] sm:$0xff] }
 0x403   :  { %v1454_v14 = vpop.f32.mrf.mxu2 }
 0x404   :  { %v1458_v15 = vadd.f32 %v1454_v14, %v1379_v54  ;;  %v2474_v54 = vld [vmem:[%s3585_s6 + $0x358] sm:$0xff]  ;;  %v2498_v14 = vld [vmem:[%s3585_s6 + $0x3e0] sm:$0xff] }
 0x40b   :  { %v1528_v17 = vpop.f32.mrf.mxu1  ;;  %v1555_v19 = vpop.f32.mrf.mxu2 }
 0x40c   :  { %v1532_v18 = vadd.f32 %v1528_v17, %v1458_v15  ;;  %2422 = vmatmul.msk.f32.vlgmr.msrb.gmra.mxu3 %vm987_vm15, %v1555_v19  ;;  %2423 = vmatmul.msk.f32.vlgmr.msra.gmra.mxu0 %vm987_vm15, %v1555_v19  ;;  %v1508_v36 = vpop.f32.mrf.mxu0  ;;  %v2499_v15 = vld [vmem:[%s3585_s6 + $0x3e8] sm:$0xff]  ;;  %v2496_v17 = vld [vmem:[%s3585_s6 + $0x3d0] sm:$0xff]  ;;  %v2494_v19 = vld [vmem:[%s3585_s6 + $0x3c0] sm:$0xff] }
 0x40d   :  { %1779 = vmatpush.msrb.mxu3 %v3028_v26  ;;  %1809 = vmatpush.msra.mxu0 %v2454_v16  ;;  %v1531_v40 = vadd.f32 %v1508_v36, %v1457_v12  ;;  %v2500_v12 = vld [vmem:[%s3585_s6 + $0x3f0] sm:$0xff]  ;;  %v2188_v16 = vld [vmem:[%s3587_s8 + $0xe8] sm:$0xff] }
 0x40f   :  { %1780 = vmatpush.msrb.mxu3 %v3030_v28  ;;  %1810 = vmatpush.msra.mxu0 %v2452_v29  ;;  %v2171_v29 = vld [vmem:[%s3587_s8 + $0x60] sm:$0xff] }
 0x411   :  { %1811 = vmatpush.msra.mxu0 %v2450_v30  ;;  %v2187_v30 = vld [vmem:[%s3587_s8 + $0xe0] sm:$0xff] }
 0x413   :  { %v1629_v21 = vpop.f32.mrf.mxu1  ;;  %1812 = vmatpush.msra.mxu0 %v2448_v31  ;;  %v2170_v31 = vld [vmem:[%s3587_s8 + $0x58] sm:$0xff] }
 0x414   :  { %2433 = vmatmul.msk.f32.vlgmr.msra.gmra.mxu2 %vm987_vm15, %v1629_v21  ;;  %2434 = vmatmul.msk.f32.vlgmr.msra.gmra.mxu3 %vm987_vm15, %v1629_v21  ;;  %v2174_v21 = vld [vmem:[%s3587_s8 + $0x78] sm:$0xff] }
 0x415   :  { %2436 = vmatmul.msk.f32.vlgmr.msrb.gmra.mxu0 %vm436_vm1, %v2435_v20  ;;  %1858 = vmatpush.msra.mxu2 %v2971_v41 }
 0x416   :  { %1908 = vmatpush.msrb.mxu0 %v2467_v32  ;;  %1888 = vmatpush.msra.mxu3 %v2466_v50  ;;  %v2186_v32 = vld [vmem:[%s3587_s8 + $0xd8] sm:$0xff]  ;;  %v2183_v50 = vld [vmem:[%s3587_s8 + $0xc0] sm:$0xff] }
 0x417   :  { %1859 = vmatpush.msra.mxu2 %v2976_v44 }
 0x418   :  { %1909 = vmatpush.msrb.mxu0 %v2465_v33  ;;  %1889 = vmatpush.msra.mxu3 %v2464_v51  ;;  %v2166_v51 = vld [vmem:[%s3587_s8 + $0x38] sm:$0xff] }
 0x41a   :  { %1910 = vmatpush.msrb.mxu0 %v2463_v34  ;;  %1890 = vmatpush.msra.mxu3 %v2462_v52  ;;  %v2182_v52 = vld [vmem:[%s3587_s8 + $0xb8] sm:$0xff] }
 0x41c   :  { %2447 = vmatmul.msk.f32.vlgmr.msrb.gmra.mxu3 %vm436_vm1, %v2435_v20  ;;  %1911 = vmatpush.msrb.mxu0 %v2461_v35  ;;  %v2495_v20 = vld [vmem:[%s3585_s6 + $0x3c8] sm:$0xff] }
 0x489   :  { %v1607_v37 = vpop.f32.mrf.mxu0 }
 0x48a   :  { %v1611_v39 = vadd.f32 %v1607_v37, %v1532_v18  ;;  %v2497_v18 = vld [vmem:[%s3585_s6 + $0x3d8] sm:$0xff] }
 0x48f   :  { %v1587_v42 = vpop.f32.mrf.mxu3 }
 0x490   :  { %v1610_v43 = vadd.f32 %v1587_v42, %v1531_v40 }
 0x492   :  { %v1708_v45 = vpop.f32.mrf.mxu0 }
 0x493   :  { %2445 = vmatmul.msk.f32.vlgmr.msrb.gmra.mxu1 %vm987_vm15, %v1708_v45  ;;  %2446 = vmatmul.msk.f32.vlgmr.msrb.gmra.mxu2 %vm987_vm15, %v1708_v45  ;;  %v2169_v45 = vld [vmem:[%s3587_s8 + $0x50] sm:$0xff] }
 0x494   :  { %1932 = vmatpush.msrb.mxu1 %v3028_v26  ;;  %1962 = vmatpush.msrb.mxu2 %v2477_v56  ;;  %v2179_v56 = vld [vmem:[%s3587_s8 + $0xa0] sm:$0xff] }
 0x496   :  { %1933 = vmatpush.msrb.mxu1 %v3030_v28  ;;  %1963 = vmatpush.msrb.mxu2 %v2475_v38  ;;  %v2162_v38 = vld [vmem:[%s3587_s8 + $0x18] sm:$0xff] }
 0x497   :  { %v1681_v46 = vpop.f32.mrf.mxu3  ;;  %v1661_v59 = vpop.f32.mrf.mxu2 }
 0x498   :  { %v1685_v48 = vadd.f32 %v1681_v46, %v1611_v39  ;;  %1964 = vmatpush.msrb.mxu2 %v2473_v57  ;;  %v1684_v60 = vadd.f32 %v1661_v59, %v1610_v43  ;;  %v2185_v46 = vld [vmem:[%s3587_s8 + $0xd0] sm:$0xff]  ;;  %v2178_v57 = vld [vmem:[%s3587_s8 + $0x98] sm:$0xff] }
 0x499   :  { %v2177_v59 = vld [vmem:[%s3587_s8 + $0x90] sm:$0xff] }
 0x49a   :  { %1965 = vmatpush.msrb.mxu2 %v2471_v58  ;;  %v2161_v58 = vld [vmem:[%s3587_s8 + $0x10] sm:$0xff] }
 0x49b   :  { %2459 = vmatmul.msk.f32.vlgmr.msra.gmra.mxu2 %vm436_vm1, %v2458_v47 }
 0x49f   :  { %v1782_v49 = vpop.f32.mrf.mxu3 }
 0x4a0   :  { %2456 = vmatmul.msk.f32.vlgmr.msra.gmra.mxu0 %vm987_vm15, %v1782_v49  ;;  %2457 = vmatmul.msk.f32.vlgmr.msra.gmra.mxu1 %vm987_vm15, %v1782_v49  ;;  %v2167_v49 = vld [vmem:[%s3587_s8 + $0x40] sm:$0xff] }
 0x4a1   :  { %2011 = vmatpush.msra.mxu0 %v2971_v41  ;;  %v2460_v41 = vld [vmem:[%s3585_s6 + $0x300] sm:$0xff]  ;;  %2041 = vmatpush.msra.mxu1 %v2489_v6 }
 0x4a2   :  { %1891 = vmatpush.msra.mxu3 %v2460_v41  ;;  %v2165_v41 = vld [vmem:[%s3587_s8 + $0x30] sm:$0xff] }
 0x4a3   :  { %2012 = vmatpush.msra.mxu0 %v2976_v44  ;;  %v2478_v44 = vld [vmem:[%s3585_s6 + $0x378] sm:$0xff] }
 0x4a4   :  { %1982 = vmatpush.msrb.mxu3 %v2478_v44  ;;  %v2181_v44 = vld [vmem:[%s3587_s8 + $0xb0] sm:$0xff] }
 0x4a6   :  { %1983 = vmatpush.msrb.mxu3 %v2476_v53  ;;  %v2164_v53 = vld [vmem:[%s3587_s8 + $0x28] sm:$0xff] }
 0x4a8   :  { %2470 = vmatmul.msk.f32.vlgmr.msrb.gmra.mxu1 %vm436_vm1, %v2458_v47  ;;  %1984 = vmatpush.msrb.mxu3 %v2474_v54  ;;  %v2168_v47 = vld [vmem:[%s3587_s8 + $0x48] sm:$0xff] }
 0x4a9   :  { %v2180_v54 = vld [vmem:[%s3587_s8 + $0xa8] sm:$0xff] }
 0x4aa   :  { %1985 = vmatpush.msrb.mxu3 %v2472_v55  ;;  %v2163_v55 = vld [vmem:[%s3587_s8 + $0x20] sm:$0xff] }
 0x510   :  { %v1740_v61 = vpop.f32.mrf.mxu1 }
 0x511   :  { %v3405_v62 = vadd.f32 %v1740_v61, %v1684_v60  ;;  %v2160_v60 = vld [vmem:[%s3587_s8 + $0x8] sm:$0xff] }
 0x512   :  { %v2176_v61 = vld [vmem:[%s3587_s8 + $0x88] sm:$0xff] }
 0x516   :  { %v1760_v63 = vpop.f32.mrf.mxu2 }
 0x517   :  { %v1764_v0 = vadd.f32 %v1760_v63, %v1685_v48  ;;  %v2184_v48 = vld [vmem:[%s3587_s8 + $0xc8] sm:$0xff]  ;;  %v2175_v63 = vld [vmem:[%s3587_s8 + $0x80] sm:$0xff] }
 0x51d   :  { %v1834_v1 = vpop.f32.mrf.mxu1  ;;  %v1814_v24 = vpop.f32.mrf.mxu0 }
 0x51e   :  { %v3407_v2 = vadd.f32 %v1834_v1, %v1764_v0  ;;  %v1861_v3 = vpop.f32.mrf.mxu2  ;;  %v1837_v35 = vadd.f32 %v1814_v24, %v3405_v62  ;;  %v2159_v62 = vld [vmem:[%s3587_s8] sm:$0xff] }
 0x51f   :  { %2468 = vmatmul.msk.f32.vlgmr.msra.gmra.mxu3 %vm987_vm15, %v1861_v3  ;;  %2469 = vmatmul.msk.f32.vlgmr.msrb.gmra.mxu0 %vm987_vm15, %v1861_v3  ;;  %v2145_v3 = vld [vmem:[%s3586_s7] sm:$0x3] }
 0x520   :  { %2085 = vmatpush.msra.mxu3 %v3028_v26  ;;  %v2490_v26 = vld [vmem:[%s3585_s6 + $0x3b8] sm:$0xff]  ;;  %2115 = vmatpush.msrb.mxu0 %v2500_v12 }
 0x521   :  { %2061 = vmatpush.msra.mxu2 %v2490_v26  ;;  %v2147_v26 = vperm.slane %v2145_v3, 0 }
 0x522   :  { %2086 = vmatpush.msra.mxu3 %v3030_v28  ;;  %v2487_v28 = vld [vmem:[%s3585_s6 + $0x3a0] sm:$0xff]  ;;  %2116 = vmatpush.msrb.mxu0 %v2498_v14 }
 0x523   :  { %2042 = vmatpush.msra.mxu1 %v2487_v28  ;;  %2062 = vmatpush.msra.mxu2 %v2488_v7  ;;  %v2148_v28 = vperm.slane %v2145_v3, 1 }
 0x524   :  { %2117 = vmatpush.msrb.mxu0 %v2496_v17 }
 0x525   :  { %v1935_v5 = vpop.f32.mrf.mxu1  ;;  %2043 = vmatpush.msra.mxu1 %v2485_v8  ;;  %2063 = vmatpush.msra.mxu2 %v2486_v9 }
 0x526   :  { %2479 = vmatmul.msk.f32.vlgmr.msrb.gmra.mxu2 %vm987_vm15, %v1935_v5  ;;  %2118 = vmatpush.msrb.mxu0 %v2494_v19 }
 0x527   :  { %2480 = vmatmul.msk.f32.vlgmr.msrb.gmra.mxu3 %vm987_vm15, %v1935_v5  ;;  %2482 = vmatmul.msk.f32.vlgmr.msra.gmra.mxu0 %vm436_vm1, %v2481_v4 }
 0x528   :  { %2044 = vmatpush.msra.mxu1 %v2483_v10  ;;  %2064 = vmatpush.msra.mxu2 %v2484_v11 }
 0x529   :  { %2215 = vmatpush.msrb.mxu3 %v2190_v22 }
 0x52a   :  { %2135 = vmatpush.msrb.mxu1 %v2501_v13  ;;  %2195 = vmatpush.msrb.mxu2 %v2174_v21 }
 0x52b   :  { %2216 = vmatpush.msrb.mxu3 %v2189_v25 }
 0x52c   :  { %2136 = vmatpush.msrb.mxu1 %v2499_v15  ;;  %2196 = vmatpush.msrb.mxu2 %v2173_v23 }
 0x52d   :  { %2217 = vmatpush.msrb.mxu3 %v2188_v16 }
 0x52e   :  { %2137 = vmatpush.msrb.mxu1 %v2497_v18  ;;  %2197 = vmatpush.msrb.mxu2 %v2172_v27  ;;  %v2507_v18 = vld [vmem:[%s3588_s9] ss:$0 sm:$0xff] }
 0x52f   :  { %2493 = vmatmul.msk.f32.vlgmr.msra.gmra.mxu3 %vm436_vm1, %v2481_v4 }
 0x530   :  { %2138 = vmatpush.msrb.mxu1 %v2495_v20  ;;  %2198 = vmatpush.msrb.mxu2 %v2171_v29 }
 0x531   :  { %2218 = vmatpush.msrb.mxu3 %v2187_v30 }
 0x532   :  { %2199 = vmatpush.msrb.mxu2 %v2170_v31 }
 0x533   :  { %2219 = vmatpush.msrb.mxu3 %v2186_v32 }
 0x534   :  { %2200 = vmatpush.msrb.mxu2 %v2169_v45 }
 0x535   :  { %2220 = vmatpush.msrb.mxu3 %v2185_v46 }
 0x536   :  { %2201 = vmatpush.msrb.mxu2 %v2168_v47 }
 0x537   :  { %2221 = vmatpush.msrb.mxu3 %v2184_v48 }
 0x538   :  { %2202 = vmatpush.msrb.mxu2 %v2167_v49 }
 0x539   :  { %2222 = vmatpush.msrb.mxu3 %v2183_v50 }
 0x53a   :  { %2203 = vmatpush.msrb.mxu2 %v2166_v51 }
 0x53b   :  { %2223 = vmatpush.msrb.mxu3 %v2182_v52 }
 0x53c   :  { %2204 = vmatpush.msrb.mxu2 %v2165_v41 }
 0x53d   :  { %2224 = vmatpush.msrb.mxu3 %v2181_v44 }
 0x53e   :  { %2205 = vmatpush.msrb.mxu2 %v2164_v53 }
 0x53f   :  { %2225 = vmatpush.msrb.mxu3 %v2180_v54 }
 0x540   :  { %2206 = vmatpush.msrb.mxu2 %v2163_v55 }
 0x541   :  { %2226 = vmatpush.msrb.mxu3 %v2179_v56 }
 0x542   :  { %2207 = vmatpush.msrb.mxu2 %v2162_v38 }
 0x543   :  { %2227 = vmatpush.msrb.mxu3 %v2178_v57 }
 0x544   :  { %2208 = vmatpush.msrb.mxu2 %v2161_v58 }
 0x545   :  { %2228 = vmatpush.msrb.mxu3 %v2177_v59 }
 0x546   :  { %2209 = vmatpush.msrb.mxu2 %v2160_v60 }
 0x547   :  { %2229 = vmatpush.msrb.mxu3 %v2176_v61 }
 0x548   :  { %2210 = vmatpush.msrb.mxu2 %v2159_v62 }
 0x549   :  { %2230 = vmatpush.msrb.mxu3 %v2175_v63 }
 0x59c   :  { %v1913_v33 = vpop.f32.mrf.mxu0 }
 0x59d   :  { %v1917_v34 = vadd.f32 %v1913_v33, %v3407_v2 }
 0x5a2   :  { %v1893_v36 = vpop.f32.mrf.mxu3 }
 0x5a3   :  { %v1916_v37 = vadd.f32 %v1893_v36, %v1837_v35 }
 0x5a4   :  { %v2014_v39 = vpop.f32.mrf.mxu0 }
 0x5a5   :  { %2491 = vmatmul.msk.f32.vlgmr.msra.gmra.mxu1 %vm987_vm15, %v2014_v39  ;;  %2492 = vmatmul.msk.f32.vlgmr.msra.gmra.mxu2 %vm987_vm15, %v2014_v39 }
 0x5a9   :  { %v1967_v0 = vpop.f32.mrf.mxu2 }
 0x5aa   :  { %v1987_v40 = vpop.f32.mrf.mxu3  ;;  %v1990_v4 = vadd.f32 %v1967_v0, %v1916_v37 }
 0x5ab   :  { %v1991_v42 = vadd.f32 %v1987_v40, %v1917_v34 }
 0x5b2   :  { %v2088_v43 = vpop.f32.mrf.mxu3 }
 0x5b3   :  { %2502 = vmatmul.msk.f32.vlgmr.msrb.gmra.mxu0 %vm987_vm15, %v2088_v43  ;;  %2503 = vmatmul.msk.f32.vlgmr.msrb.gmra.mxu1 %vm987_vm15, %v2088_v43 }
 0x622   :  { %v2046_v1 = vpop.f32.mrf.mxu1 }
 0x623   :  { %v2069_v5 = vadd.f32 %v2046_v1, %v1990_v4 }
 0x628   :  { %v2066_v2 = vpop.f32.mrf.mxu2 }
 0x629   :  { %v2070_v6 = vadd.f32 %v2066_v2, %v1991_v42 }
 0x630   :  { %v2120_v7 = vpop.f32.mrf.mxu0  ;;  %v2140_v8 = vpop.f32.mrf.mxu1 }
 0x631   :  { %v2143_v9 = vadd.f32 %v2120_v7, %v2069_v5  ;;  %v2144_v10 = vadd.f32 %v2140_v8, %v2070_v6 }
 0x633   :  { %v2151_v11 = vadd.f32 %v2147_v26, %v2143_v9  ;;  %v2152_v12 = vadd.f32 %v2148_v28, %v2144_v10 }
 0x635   :  { %v2155_v13 = vmul.f32 0.01, %v2151_v11  ;;  %v2156_v14 = vmul.f32 0.01, %v2152_v12  ;;  %vm2153_vm1 = vcmp.ge.f32.partialorder %v2151_v11, 0.0  ;;  %vm2154_vm0 = vcmp.ge.f32.partialorder %v2152_v12, 0.0 }
 0x637   :  { %v2157_v15 = vsel %vm2153_vm1, %v2151_v11, %v2155_v13  ;;  %v2158_v17 = vsel %vm2154_vm0, %v2152_v12, %v2156_v14 }
 0x638   :  { %2211 = vmatmul.f32.vlgmr.msrb.gmra.mxu2 %v2157_v15  ;;  %2231 = vmatmul.f32.vlgmr.msrb.gmra.mxu3 %v2158_v17 }
 0x6bb   :  { %v2212_v19 = vpop.f32.mrf.mxu2  ;;  %v2232_v21 = vpop.f32.mrf.mxu3 }
 0x6bc   :  { %v2213_v20 = vadd.f32 %v2507_v18, %v2212_v19 }
 0x6be   :  { %v2233_v22 = vadd.f32 %v2232_v21, %v2213_v20 }
 0x6c0   :  { %2236 = vst.msk [vmem:[#allocation2] sm:$0x3] %vm2235_vm2, %v2233_v22 }
 0x6c1   :  { %2247 = dma.vmem_to_hbm [thread:$0]  %s2243_s13, 32, %s2245_s16, [#allocation3]  }
 0x6c2   :  { %2532 = dma.done.wait [#allocation3], 32  }
 0x6c3   :  { %2533 = vsyncadd [#allocation3], 4294967264 }
 0x6c4   :  { %2252 = vsyncpa [#allocation3], 1 }

</bundles_post_ra>
